<compile_context>
chip_gen: v7x
topology: tpu7x:2x2x1
jax: 0.10.0
libtpu: 0.0.40
codegen_flags: <defaults>
</compile_context>

<pallas_src>
import functools

import jax
import jax.numpy as jnp
from jax.experimental import pallas as pl
from jax.experimental.pallas import tpu as pltpu

HIDDEN = 784   # fixed by the module definition
LANE = 128


def _round_up(x, m):
    return (x + m - 1) // m * m


def _masse_kernel(x_ref, w1_ref, b1_ref, w2q_ref, w2s_ref, b2_ref, w3_ref, b3_ref, o_ref):
    # Layer 1: Linear (context mask pre-folded into W1/b1) -> ReLU. Dropout = identity.
    x = x_ref[...]                                              # f32 (TB, n_in)
    h1 = jnp.dot(x.astype(jnp.bfloat16), w1_ref[...],
                 preferred_element_type=jnp.float32)            # bf16 x bf16 -> f32 acc
    h1 = jnp.maximum(h1 + b1_ref[...], 0.0)                     # f32 bias + ReLU

    # Layer 2: int8 weight (per-output-channel symmetric quant, mask folded).
    # Identity: h1 @ (Wq * s) == (h1 @ Wq) * s. int8 values are exact in bf16, the scale is
    # applied in f32 after the matmul -> no integer MXU path needed (safe on v5e/v6e/v7x).
    w2 = w2q_ref[...].astype(jnp.bfloat16)
    h2 = jnp.dot(h1.astype(jnp.bfloat16), w2, preferred_element_type=jnp.float32)
    h2 = jnp.maximum(h2 * w2s_ref[...] + b2_ref[...], 0.0)

    # Layer 3: readout (bf16 weights, f32 accumulate), lane-dense padded output.
    y = jnp.dot(h2.astype(jnp.bfloat16), w3_ref[...], preferred_element_type=jnp.float32)
    o_ref[...] = (y + b3_ref[...]).astype(o_ref.dtype)


@functools.partial(jax.jit, static_argnames=("n_out", "block_b"))
def masse_forward(x, w1, b1, w2q, w2s, b2, w3, b3, *, n_out, block_b=256):
    """x: (B, n_in) f32. Weight args are the *prepared* (mask-folded, padded, low-precision)
    params from prepare_params()."""
    B, n_in = x.shape
    hp = w1.shape[1]          # 896
    nout_p = w3.shape[1]      # round_up(n_out, 128)

    # ---- batch tiling: single tile for small/medium batches, 256-row tiles otherwise ----
    b8 = _round_up(B, 8)
    tb = b8 if b8 <= 2 * block_b else block_b
    bp = b8
    if bp != B:                                   # only sublane padding, rarely taken
        x = jnp.pad(x, ((0, bp - B), (0, 0)))
    num_tiles = pl.cdiv(bp, tb)                   # partial last tile handled by Pallas masking
    grid = (num_tiles,)

    # ---- megacore decision: only split across cores when per-tile activation traffic
    #      outweighs the weight fetch that each core would duplicate (v7x) ----
    weight_bytes = (w1.size * 2 + w2q.size + w3.size * 2
                    + (b1.size + w2s.size + b2.size + b3.size) * 4)
    tile_io_bytes = tb * (n_in + nout_p) * 4
    dim_sem = ("parallel",) if (num_tiles >= 2 and tile_io_bytes >= weight_bytes) \
        else ("arbitrary",)

    flops = 2 * num_tiles * tb * (n_in * hp + hp * hp + hp * nout_p)
    bytes_accessed = bp * n_in * 4 + bp * nout_p * 4 + weight_bytes

    # Weights/biases: whole-array, single-buffered, resident in VMEM for the full kernel.
    resident = pl.BlockSpec(memory_space=pltpu.MemorySpace.VMEM)

    out = pl.pallas_call(
        _masse_kernel,
        out_shape=jax.ShapeDtypeStruct((bp, nout_p), jnp.float32),
        grid=grid,
        in_specs=[
            pl.BlockSpec((tb, n_in), lambda i: (i, 0)),   # x tiles stream through
            resident,                                     # W1  (n_in, 896) bf16
            resident,                                     # b1  (1, 896)   f32
            resident,                                     # W2q (896, 896) int8
            resident,                                     # W2 scale (1, 896) f32
            resident,                                     # b2  (1, 896)   f32
            resident,                                     # W3  (896, nout_p) bf16
            resident,                                     # b3  (1, nout_p) f32
        ],
        out_specs=pl.BlockSpec((tb, nout_p), lambda i: (i, 0)),
        compiler_params=pltpu.CompilerParams(
            dimension_semantics=dim_sem,
            vmem_limit_bytes=32 << 20,        # footprint ~3-8 MiB; plenty of headroom on v7x
        ),
        cost_estimate=pl.CostEstimate(
            flops=flops, transcendentals=0, bytes_accessed=bytes_accessed),
    )(x, w1, b1, w2q, w2s, b2, w3, b3)

    # Avoid no-op copies: only slice dimensions that were actually padded.
    if bp != B:
        out = out[:B]
    if nout_p != n_out:
        out = out[:, :n_out]
    return out


def init_params(key, n_in, n_out, n_contexts, sparsity):
    """Deterministic parameter init (Kaiming-uniform-like fan-in bound, matching nn.Linear)."""
    ks = jax.random.split(key, 8)

    def linear(kw, kb, fan_in, fan_out):
        bound = 1.0 / jnp.sqrt(jnp.float32(fan_in))
        w = jax.random.uniform(kw, (fan_in, fan_out), jnp.float32, -bound, bound)
        b = jax.random.uniform(kb, (1, fan_out), jnp.float32, -bound, bound)
        return w, b

    w1, b1 = linear(ks[0], ks[1], n_in, HIDDEN)
    w2, b2 = linear(ks[2], ks[3], HIDDEN, HIDDEN)
    w3, b3 = linear(ks[4], ks[5], HIDDEN, n_out)

    # Per-context deterministic binary masks: fraction `sparsity` of units gated off.
    def make_masks(k):
        u = jax.random.uniform(k, (n_contexts, HIDDEN), jnp.float32)
        return (u >= sparsity).astype(jnp.float32)

    masks1 = make_masks(ks[6])
    masks2 = make_masks(ks[7])
    return (w1, b1, w2, b2, w3, b3, masks1, masks2)


def prepare_params(raw, context, n_in, n_out):
    """Fold the per-context binary gates into the weights/biases, pad the hidden/output lane
    dims to multiples of 128 (exact: padded units are zero), cast W1/W3 to bf16 and quantize
    W2 to int8 with a per-output-channel scale. Run once per context (constant), NOT per call."""
    w1, b1, w2, b2, w3, b3, masks1, masks2 = raw
    m1 = masks1[context][None, :]
    m2 = masks2[context][None, :]

    # relu((a W + b) * m) == relu(a (W*m) + b*m) for a binary (non-negative) mask m.
    w1f, b1f = w1 * m1, b1 * m1
    w2f, b2f = w2 * m2, b2 * m2

    hp = _round_up(HIDDEN, LANE)      # 784 -> 896 (deliberately NOT 1024: DMA-bound kernel)
    nout_p = _round_up(n_out, LANE)

    def pad_cols(a, cols):
        return jnp.zeros((a.shape[0], cols), a.dtype).at[:, :a.shape[1]].set(a)

    # W1: rows kept at n_in (no input padding), columns padded to 896, bf16.
    w1p = pad_cols(w1f, hp).astype(jnp.bfloat16)
    b1p = pad_cols(b1f, hp)

    # W2: padded to (896, 896) then int8 per-output-channel symmetric quantization.
    w2_pad = jnp.zeros((hp, hp), jnp.float32).at[:HIDDEN, :HIDDEN].set(w2f)
    maxabs = jnp.max(jnp.abs(w2_pad), axis=0, keepdims=True)          # (1, hp)
    w2s = jnp.where(maxabs > 0.0, maxabs / 127.0, 1.0)                # zero (masked) cols -> 1
    w2q = jnp.clip(jnp.round(w2_pad / w2s), -127, 127).astype(jnp.int8)
    b2p = pad_cols(b2f, hp)

    # W3: rows padded to 896, columns padded to 128-multiple, bf16.
    w3p = jnp.zeros((hp, nout_p), jnp.float32).at[:HIDDEN, :n_out].set(w3).astype(jnp.bfloat16)
    b3p = pad_cols(b3, nout_p)
    return (w1p, b1p, w2q, w2s, b2p, w3p, b3p)


def reference_forward(x, w1, b1, mask1, w2, b2, mask2, w3, b3):
    h1 = jnp.maximum((x @ w1 + b1) * mask1, 0.0)
    h2 = jnp.maximum((h1 @ w2 + b2) * mask2, 0.0)
    return h2 @ w3 + b3


if __name__ == "__main__":
    B, N_IN, N_OUT, N_CTX = 16, 64, 10, 4
    SPARSITY = 0.5
    CONTEXT = 1

    key = jax.random.PRNGKey(0)
    k_x, k_p = jax.random.split(key)
    x = jax.random.normal(k_x, (B, N_IN), jnp.float32)

    raw = init_params(k_p, N_IN, N_OUT, N_CTX, SPARSITY)
    params = prepare_params(raw, CONTEXT, N_IN, N_OUT)   # fold masks / pad / quantize, once

    out = masse_forward(x, *params, n_out=N_OUT)
    out = jax.block_until_ready(out)

    w1, b1, w2, b2, w3, b3, masks1, masks2 = raw
    ref = reference_forward(x, w1, b1, masks1[CONTEXT][None, :],
                            w2, b2, masks2[CONTEXT][None, :], w3, b3)
    assert out.shape == (B, N_OUT)
    max_err = float(jnp.max(jnp.abs(out - ref)))
    assert jnp.allclose(out, ref, atol=2.5e-2, rtol=2.5e-2), max_err

    print("KERNEL_OK")
</pallas_src>

<mosaic_0001>
module attributes {stable_mosaic.version = 11 : i64} {
  func.func @_masse_kernel(%arg0: i32, %arg1: memref<16x64xf32, #tpu.memory_space<vmem>>, %arg2: memref<64x896xbf16, #tpu.memory_space<vmem>>, %arg3: memref<1x896xf32, #tpu.memory_space<vmem>>, %arg4: memref<896x896xi8, #tpu.memory_space<vmem>>, %arg5: memref<1x896xf32, #tpu.memory_space<vmem>>, %arg6: memref<1x896xf32, #tpu.memory_space<vmem>>, %arg7: memref<896x128xbf16, #tpu.memory_space<vmem>>, %arg8: memref<1x128xf32, #tpu.memory_space<vmem>>, %arg9: memref<16x128xf32, #tpu.memory_space<vmem>>) attributes {dimension_semantics = [#tpu.dimension_semantics<arbitrary>], iteration_bounds = array<i64: 1>, scalar_prefetch = 0 : i64, scratch_operands = 0 : i64, tpu.core_type = #tpu.core_type<tc>, window_params = [{transform_indices = @transform_0, window_bounds = array<i64: 16, 64>}, {pipeline_mode = #tpu.pipeline_mode<synchronous>, transform_indices = @transform_1, window_bounds = array<i64: 64, 896>}, {pipeline_mode = #tpu.pipeline_mode<synchronous>, transform_indices = @transform_2, window_bounds = array<i64: 1, 896>}, {pipeline_mode = #tpu.pipeline_mode<synchronous>, transform_indices = @transform_3, window_bounds = array<i64: 896, 896>}, {pipeline_mode = #tpu.pipeline_mode<synchronous>, transform_indices = @transform_4, window_bounds = array<i64: 1, 896>}, {pipeline_mode = #tpu.pipeline_mode<synchronous>, transform_indices = @transform_5, window_bounds = array<i64: 1, 896>}, {pipeline_mode = #tpu.pipeline_mode<synchronous>, transform_indices = @transform_6, window_bounds = array<i64: 896, 128>}, {pipeline_mode = #tpu.pipeline_mode<synchronous>, transform_indices = @transform_7, window_bounds = array<i64: 1, 128>}, {transform_indices = @transform_8, window_bounds = array<i64: 16, 128>}]} {
    %c0 = arith.constant 0 : index
    %c0_0 = arith.constant 0 : index
    %0 = vector.load %arg1[%c0, %c0_0] : memref<16x64xf32, #tpu.memory_space<vmem>>, vector<16x64xf32>
    %1 = arith.truncf %0 : vector<16x64xf32> to vector<16x64xbf16>
    %c0_1 = arith.constant 0 : index
    %c0_2 = arith.constant 0 : index
    %2 = vector.load %arg2[%c0_1, %c0_2] : memref<64x896xbf16, #tpu.memory_space<vmem>>, vector<64x896xbf16>
    %cst = arith.constant dense<0.000000e+00> : vector<16x896xf32>
    %3 = tpu.matmul %1, %2, %cst {dimension_numbers = #tpu.dot_dimension_numbers<[1], [0], [0], [1], [0, 0, 1, 1], [], []>} : vector<16x64xbf16>, vector<64x896xbf16>, vector<16x896xf32> -> vector<16x896xf32>
    %c0_3 = arith.constant 0 : index
    %c0_4 = arith.constant 0 : index
    %4 = vector.load %arg3[%c0_3, %c0_4] : memref<1x896xf32, #tpu.memory_space<vmem>>, vector<1x896xf32>
    %5 = vector.broadcast %4 : vector<1x896xf32> to vector<16x896xf32>
    %6 = arith.addf %3, %5 : vector<16x896xf32>
    %cst_5 = arith.constant 0.000000e+00 : f32
    %7 = vector.broadcast %cst_5 : f32 to vector<16x896xf32>
    %8 = arith.maximumf %6, %7 : vector<16x896xf32>
    %c0_6 = arith.constant 0 : index
    %c0_7 = arith.constant 0 : index
    %9 = vector.load %arg4[%c0_6, %c0_7] : memref<896x896xi8, #tpu.memory_space<vmem>>, vector<896x896xi8>
    %10 = arith.sitofp %9 : vector<896x896xi8> to vector<896x896xbf16>
    %11 = arith.truncf %8 : vector<16x896xf32> to vector<16x896xbf16>
    %cst_8 = arith.constant dense<0.000000e+00> : vector<16x896xf32>
    %12 = tpu.matmul %11, %10, %cst_8 {dimension_numbers = #tpu.dot_dimension_numbers<[1], [0], [0], [1], [0, 0, 1, 1], [], []>} : vector<16x896xbf16>, vector<896x896xbf16>, vector<16x896xf32> -> vector<16x896xf32>
    %c0_9 = arith.constant 0 : index
    %c0_10 = arith.constant 0 : index
    %13 = vector.load %arg5[%c0_9, %c0_10] : memref<1x896xf32, #tpu.memory_space<vmem>>, vector<1x896xf32>
    %14 = vector.broadcast %13 : vector<1x896xf32> to vector<16x896xf32>
    %15 = arith.mulf %12, %14 : vector<16x896xf32>
    %c0_11 = arith.constant 0 : index
    %c0_12 = arith.constant 0 : index
    %16 = vector.load %arg6[%c0_11, %c0_12] : memref<1x896xf32, #tpu.memory_space<vmem>>, vector<1x896xf32>
    %17 = vector.broadcast %16 : vector<1x896xf32> to vector<16x896xf32>
    %18 = arith.addf %15, %17 : vector<16x896xf32>
    %cst_13 = arith.constant 0.000000e+00 : f32
    %19 = vector.broadcast %cst_13 : f32 to vector<16x896xf32>
    %20 = arith.maximumf %18, %19 : vector<16x896xf32>
    %21 = arith.truncf %20 : vector<16x896xf32> to vector<16x896xbf16>
    %c0_14 = arith.constant 0 : index
    %c0_15 = arith.constant 0 : index
    %22 = vector.load %arg7[%c0_14, %c0_15] : memref<896x128xbf16, #tpu.memory_space<vmem>>, vector<896x128xbf16>
    %cst_16 = arith.constant dense<0.000000e+00> : vector<16x128xf32>
    %23 = tpu.matmul %21, %22, %cst_16 {dimension_numbers = #tpu.dot_dimension_numbers<[1], [0], [0], [1], [0, 0, 1, 1], [], []>} : vector<16x896xbf16>, vector<896x128xbf16>, vector<16x128xf32> -> vector<16x128xf32>
    %c0_17 = arith.constant 0 : index
    %c0_18 = arith.constant 0 : index
    %24 = vector.load %arg8[%c0_17, %c0_18] : memref<1x128xf32, #tpu.memory_space<vmem>>, vector<1x128xf32>
    %25 = vector.broadcast %24 : vector<1x128xf32> to vector<16x128xf32>
    %26 = arith.addf %23, %25 : vector<16x128xf32>
    %c0_19 = arith.constant 0 : index
    %c0_20 = arith.constant 0 : index
    %27 = vector.load %arg9[%c0_19, %c0_20] : memref<16x128xf32, #tpu.memory_space<vmem>>, vector<16x128xf32>
    tpu.vector_store %arg9[%c0_19, %c0_20], %26 {strides = array<i32>} : memref<16x128xf32, #tpu.memory_space<vmem>>, vector<16x128xf32>,
    return
  }
  func.func @transform_0(%arg0: i32) -> (i32, i32) {
    %c0_i32 = arith.constant 0 : i32
    %c0_i32_0 = arith.constant 0 : i32
    return %arg0, %c0_i32 : i32, i32
  }
  func.func @transform_1(%arg0: i32) -> (i32, i32) {
    %c0_i32 = arith.constant 0 : i32
    %c0_i32_0 = arith.constant 0 : i32
    %c0_i32_1 = arith.constant 0 : i32
    return %c0_i32, %c0_i32_0 : i32, i32
  }
  func.func @transform_2(%arg0: i32) -> (i32, i32) {
    %c0_i32 = arith.constant 0 : i32
    %c0_i32_0 = arith.constant 0 : i32
    %c0_i32_1 = arith.constant 0 : i32
    return %c0_i32, %c0_i32_0 : i32, i32
  }
  func.func @transform_3(%arg0: i32) -> (i32, i32) {
    %c0_i32 = arith.constant 0 : i32
    %c0_i32_0 = arith.constant 0 : i32
    %c0_i32_1 = arith.constant 0 : i32
    return %c0_i32, %c0_i32_0 : i32, i32
  }
  func.func @transform_4(%arg0: i32) -> (i32, i32) {
    %c0_i32 = arith.constant 0 : i32
    %c0_i32_0 = arith.constant 0 : i32
    %c0_i32_1 = arith.constant 0 : i32
    return %c0_i32, %c0_i32_0 : i32, i32
  }
  func.func @transform_5(%arg0: i32) -> (i32, i32) {
    %c0_i32 = arith.constant 0 : i32
    %c0_i32_0 = arith.constant 0 : i32
    %c0_i32_1 = arith.constant 0 : i32
    return %c0_i32, %c0_i32_0 : i32, i32
  }
  func.func @transform_6(%arg0: i32) -> (i32, i32) {
    %c0_i32 = arith.constant 0 : i32
    %c0_i32_0 = arith.constant 0 : i32
    %c0_i32_1 = arith.constant 0 : i32
    return %c0_i32, %c0_i32_0 : i32, i32
  }
  func.func @transform_7(%arg0: i32) -> (i32, i32) {
    %c0_i32 = arith.constant 0 : i32
    %c0_i32_0 = arith.constant 0 : i32
    %c0_i32_1 = arith.constant 0 : i32
    return %c0_i32, %c0_i32_0 : i32, i32
  }
  func.func @transform_8(%arg0: i32) -> (i32, i32) {
    %c0_i32 = arith.constant 0 : i32
    %c0_i32_0 = arith.constant 0 : i32
    return %arg0, %c0_i32 : i32, i32
  }
}

</mosaic_0001>

<bundles_post_ra>
// kernel: masse_forward.1
= control target key start
LH: loop header
LB: loop body
LE: loop exit
PB: predicated region body
PF: predicated region fallthrough
CT: control target
= control target key end

     0   :  { %13 = vsyncpa [#allocation3], 0  ;;  %s3431_s0 = inlined_call_operand.hbm [shape: f32[16,64], index: 0, kind: input, shape index: {}]   ;;  %s3432_s1 = inlined_call_operand.hbm [shape: bf16[64,896], index: 1, kind: input, shape index: {}]   ;;  %s3433_s2 = inlined_call_operand.vmem [shape: f32[1,896], index: 2, kind: input, shape index: {}]   ;;  %s3434_s3 = inlined_call_operand.hbm [shape: s8[896,896], index: 3, kind: input, shape index: {}]   ;;  %s3435_s4 = inlined_call_operand.vmem [shape: f32[1,896], index: 4, kind: input, shape index: {}]   ;;  %s3436_s5 = inlined_call_operand.hbm [shape: f32[1,896], index: 5, kind: input, shape index: {}]   ;;  %s3437_s6 = inlined_call_operand.hbm [shape: bf16[896,128], index: 6, kind: input, shape index: {}]   ;;  %s3438_s7 = inlined_call_operand.vmem [shape: f32[1,128], index: 7, kind: input, shape index: {}]   ;;  %s3439_s8 = inlined_call_operand.hbm [shape: f32[16,128], index: 8, kind: output, shape index: {}]  }
   0x1   :  { %14 = vsyncpa [#allocation6], 0 }
   0x2   :  { %15 = vsyncpa [#allocation9], 0 }
   0x3   :  { %16 = vsyncpa [#allocation4], 0  ;;  %s3124_s27 = smov [#allocation5]   ;;  %s2984_s9 = scalar_lea.hbm %s3432_s1, 3584 }
   0x4   :  { %s34_s28 = sshll.u32 %s3124_s27, 4  ;;  %p2985_p0 = scmp.ne.s32.totalorder %s3432_s1, %s2984_s9  ;;  %s35_s28 = int_to_ptr.vmem [resolvable:$true] %s34_s28 }
   0x5   :  { %p2988_p1 = scmp.lt.u32.totalorder %s2984_s9, %s3432_s1 }
   0x7   :  { %p2990_p2 = pnand %p2988_p1, %p2985_p0 }
   0x9   :  { %2993 = shalt.err (!%p2990_p2)
}
   0xa   :  { %s2994_s14 = scalar_lea.vmem %s35_s28, 3584  ;;  %p2999_p4 = scmp.lt.s32.totalorder %s35_s28, %s35_s28 }
   0xb   :  { %p2995_p3 = scmp.ne.s32.totalorder %s35_s28, %s2994_s14  ;;  %p3000_p5 = scmp.lt.s32.totalorder %s2994_s14, %s2994_s14 }
   0xd   :  { %p3001_p6 = por %p3000_p5, %p2999_p4 }
   0xf   :  { %p3002_p7 = pnand %p3001_p6, %p2995_p3 }
  0x11   :  { %3005 = shalt.err (!%p3002_p7)
}
  0x12   :  { %s3125_s15 = smov 448   ;;  %s3126_s16 = smov 28  }
  0x13   :  { %40 = dma.hbm_to_vmem [thread:$0]  %s3432_s1, 3584, %s35_s28, [#allocation6], %s3125_s15, %s3125_s15, %s3126_s16  }
  0x14   :  { %s3127_s19 = smov [#allocation8]   ;;  %s3128_s21 = smov [#allocation2]  }
  0x15   :  { %s63_s20 = sshll.u32 %s3127_s19, 4  ;;  %s22_s22 = sshll.u32 %s3128_s21, 4  ;;  %s64_s20 = int_to_ptr.vmem [resolvable:$true] %s63_s20  ;;  %s23_s22 = int_to_ptr.vmem [resolvable:$true] %s22_s22 }
  0x16   :  { %s3006_s25 = scalar_lea.hbm %s3436_s5, 112 }
  0x17   :  { %p3007_p8 = scmp.ne.s32.totalorder %s3436_s5, %s3006_s25  ;;  %p3010_p9 = scmp.lt.u32.totalorder %s3006_s25, %s3436_s5 }
  0x19   :  { %p3012_p10 = pnand %p3010_p9, %p3007_p8 }
  0x1b   :  { %3015 = shalt.err (!%p3012_p10)
}
  0x1c   :  { %s3016_s1 = scalar_lea.vmem %s64_s20, 112  ;;  %s3020_s28 = scalar_lea.vmem %s64_s20, 128 }
  0x1d   :  { %p3017_p11 = scmp.ne.s32.totalorder %s64_s20, %s3016_s1  ;;  %p3021_p12 = scmp.lt.s32.totalorder %s64_s20, %s64_s20 }
  0x1e   :  { %p3022_p13 = scmp.lt.s32.totalorder %s3020_s28, %s3016_s1 }
  0x20   :  { %p3023_p0 = por %p3022_p13, %p3021_p12 }
  0x22   :  { %p3024_p1 = pnand %p3023_p0, %p3017_p11 }
  0x24   :  { %3027 = shalt.err (!%p3024_p1)
}
  0x25   :  { %66 = dma.hbm_to_vmem [thread:$0]  %s3436_s5, 112, %s64_s20, [#allocation9]  }
  0x26   :  { %s3028_s13 = scalar_lea.hbm %s3431_s0, 256 }
  0x27   :  { %p3029_p2 = scmp.ne.s32.totalorder %s3431_s0, %s3028_s13  ;;  %p3032_p3 = scmp.lt.u32.totalorder %s3028_s13, %s3431_s0 }
  0x29   :  { %p3034_p4 = pnand %p3032_p3, %p3029_p2 }
  0x2b   :  { %3037 = shalt.err (!%p3034_p4)
}
  0x2c   :  { %s3038_s18 = scalar_lea.vmem %s23_s22, 256  ;;  %p3043_p6 = scmp.lt.s32.totalorder %s23_s22, %s23_s22 }
  0x2d   :  { %p3039_p5 = scmp.ne.s32.totalorder %s23_s22, %s3038_s18  ;;  %p3044_p7 = scmp.lt.s32.totalorder %s3038_s18, %s3038_s18 }
  0x2f   :  { %p3045_p8 = por %p3044_p7, %p3043_p6 }
  0x31   :  { %p3046_p9 = pnand %p3045_p8, %p3039_p5 }
  0x33   :  { %3049 = shalt.err (!%p3046_p9)
}
  0x34   :  { %s3129_s5 = smov 128   ;;  %s3130_s19 = smov 8  }
  0x35   :  { %28 = dma.hbm_to_vmem [thread:$0]  %s3431_s0, 256, %s23_s22, [#allocation3], %s3129_s5, %s3129_s5, %s3130_s19  }
  0x36   :  { %s3131_s23 = smov [#allocation7]   ;;  %s3050_s27 = scalar_lea.hbm %s3434_s3, 25088 }
  0x37   :  { %s48_s24 = sshll.u32 %s3131_s23, 4  ;;  %p3051_p10 = scmp.ne.s32.totalorder %s3434_s3, %s3050_s27  ;;  %s49_s24 = int_to_ptr.vmem [resolvable:$true] %s48_s24 }
  0x38   :  { %p3054_p11 = scmp.lt.u32.totalorder %s3050_s27, %s3434_s3 }
  0x3a   :  { %p3056_p12 = pnand %p3054_p11, %p3051_p10 }
  0x3c   :  { %3059 = shalt.err (!%p3056_p12)
}
  0x3d   :  { %s3060_s9 = scalar_lea.vmem %s49_s24, 25088  ;;  %p3065_p0 = scmp.lt.s32.totalorder %s49_s24, %s49_s24 }
  0x3e   :  { %p3061_p13 = scmp.ne.s32.totalorder %s49_s24, %s3060_s9  ;;  %p3066_p1 = scmp.lt.s32.totalorder %s3060_s9, %s3060_s9 }
  0x40   :  { %p3067_p2 = por %p3066_p1, %p3065_p0 }
  0x42   :  { %p3068_p3 = pnand %p3067_p2, %p3061_p13 }
  0x44   :  { %3071 = shalt.err (!%p3068_p3)
}
  0x45   :  { %s3132_s0 = smov 896   ;;  %s3133_s22 = smov 56  }
  0x46   :  { %54 = dma.hbm_to_vmem [thread:$0]  %s3434_s3, 25088, %s49_s24, [#allocation6], %s3132_s0, %s3132_s0, %s3133_s22  }
  0x47   :  { %s3134_s12 = smov [#allocation10]   ;;  %s3072_s16 = scalar_lea.hbm %s3437_s6, 7168 }
  0x48   :  { %s72_s13 = sshll.u32 %s3134_s12, 4  ;;  %p3073_p4 = scmp.ne.s32.totalorder %s3437_s6, %s3072_s16  ;;  %s73_s13 = int_to_ptr.vmem [resolvable:$true] %s72_s13 }
  0x49   :  { %p3076_p5 = scmp.lt.u32.totalorder %s3072_s16, %s3437_s6 }
  0x4b   :  { %p3078_p6 = pnand %p3076_p5, %p3073_p4 }
  0x4d   :  { %3081 = shalt.err (!%p3078_p6)
}
  0x4e   :  { %s3082_s23 = scalar_lea.vmem %s73_s13, 7168  ;;  %p3087_p8 = scmp.lt.s32.totalorder %s73_s13, %s73_s13 }
  0x4f   :  { %p3083_p7 = scmp.ne.s32.totalorder %s73_s13, %s3082_s23  ;;  %p3088_p9 = scmp.lt.s32.totalorder %s3082_s23, %s3082_s23 }
  0x51   :  { %p3089_p10 = por %p3088_p9, %p3087_p8 }
  0x53   :  { %p3090_p11 = pnand %p3089_p10, %p3083_p7 }
  0x55   :  { %3093 = shalt.err (!%p3090_p11)
}
  0x56   :  { %s3135_s3 = smov 64   ;;  %s3136_s24 = smov 4  }
  0x57   :  { %78 = dma.hbm_to_vmem [thread:$0]  %s3437_s6, 7168, %s73_s13, [#allocation9], %s3135_s3, %s3135_s3, %s3136_s24  }
  0x58   :  { %3116 = dma.done.wait [#allocation3], 256  }
  0x59   :  { %3117 = vsyncadd [#allocation3], 4294967040 }
  0x5a   :  { %3118 = dma.done.wait [#allocation6], 28672  }
  0x5b   :  { %3119 = vsyncadd [#allocation6], 4294938624 }
  0x5c   :  { %3120 = dma.done.wait [#allocation9], 7280  }
  0x5d   :  { %3121 = vsyncadd [#allocation9], 4294960016  ;;  %v3137_v0 = vmov 0   ;;  %v2888_v1 = vld [vmem:[#allocation5 + $0x4] ss:$28 sps:$4 sm:$0xff]   ;;  %v97_v9 = vld [vmem:[#allocation2] sm:$0xff] }
  0x5e   :  { %349 = vmatprep.mubr.bf16.mxu1 %v3137_v0  ;;  %435 = vmatprep.mubr.bf16.mxu0 %v3137_v0  ;;  %v2890_v2 = vld [vmem:[#allocation5] ss:$28 sps:$4 sm:$0xff]   ;;  %v2893_v4 = vld [vmem:[#allocation5 + $0x38] ss:$28 sps:$4 sm:$0xff]   ;;  %v2896_v6 = vld [vmem:[#allocation5 + $0x70] ss:$28 sps:$4 sm:$0xff]  }
  0x5f   :  { %317 = vmatprep.subr.bf16.mxu1 %v2888_v1  ;;  %v2891_v3 = vld [vmem:[#allocation5 + $0x3c] ss:$28 sps:$4 sm:$0xff]   ;;  %v2894_v5 = vld [vmem:[#allocation5 + $0x74] ss:$28 sps:$4 sm:$0xff]   ;;  %v2897_v7 = vld [vmem:[#allocation5 + $0xac] ss:$28 sps:$4 sm:$0xff]  }
  0x60   :  { %318 = vmatpush1.bf16.msra.mxu1 %v2890_v2  ;;  %v2899_v8 = vld [vmem:[#allocation5 + $0xa8] ss:$28 sps:$4 sm:$0xff]   ;;  %v98_v10 = vld [vmem:[#allocation2 + $0x8] sm:$0xff]  ;;  %v2912_v12 = vld [vmem:[#allocation5 + $0x14] ss:$28 sps:$4 sm:$0xff]   ;;  %vm313_vm0 = vcmask 523264  }
  0x61   :  { %319 = vmatprep.subr.bf16.mxu1 %v2891_v3  ;;  %v2902_v11 = vld [vmem:[#allocation5 + $0xc] ss:$28 sps:$4 sm:$0xff]   ;;  %v3251_v15 = vpack.c.bf16 %v98_v10, %v97_v9  ;;  %403 = vmatprep.subr.bf16.mxu0 %v2912_v12  ;;  %v2905_v17 = vld [vmem:[#allocation5 + $0x44] ss:$28 sps:$4 sm:$0xff]   ;;  %v2908_v21 = vld [vmem:[#allocation5 + $0x7c] ss:$28 sps:$4 sm:$0xff]  }
  0x62   :  { %v2914_v13 = vld [vmem:[#allocation5 + $0x10] ss:$28 sps:$4 sm:$0xff]   ;;  %v2900_v16 = vld [vmem:[#allocation5 + $0x8] ss:$28 sps:$4 sm:$0xff]   ;;  %v2903_v20 = vld [vmem:[#allocation5 + $0x40] ss:$28 sps:$4 sm:$0xff]  }
  0x63   :  { %v2915_v14 = vld [vmem:[#allocation5 + $0x4c] ss:$28 sps:$4 sm:$0xff]   ;;  %404 = vmatpush1.bf16.msra.mxu0 %v2914_v13  ;;  %v2918_v19 = vld [vmem:[#allocation5 + $0x84] ss:$28 sps:$4 sm:$0xff]   ;;  %v2921_v23 = vld [vmem:[#allocation5 + $0xbc] ss:$28 sps:$4 sm:$0xff]  }
  0x64   :  { %320 = vmatpush1.bf16.msra.mxu1 %v2893_v4  ;;  %405 = vmatprep.subr.bf16.mxu0 %v2915_v14  ;;  %v2917_v18 = vld [vmem:[#allocation5 + $0x48] ss:$28 sps:$4 sm:$0xff]   ;;  %v2920_v22 = vld [vmem:[#allocation5 + $0x80] ss:$28 sps:$4 sm:$0xff]   ;;  %v2906_v25 = vld [vmem:[#allocation5 + $0x78] ss:$28 sps:$4 sm:$0xff]  }
  0x65   :  { %321 = vmatprep.subr.bf16.mxu1 %v2894_v5  ;;  %v502_v24 = vld [vmem:[#allocation7 + $0x8] sm:$0xff]  ;;  %v2911_v26 = vld [vmem:[#allocation5 + $0xb4] ss:$28 sps:$4 sm:$0xff]   ;;  %v501_v29 = vld [vmem:[#allocation7] sm:$0xff]  ;;  %v3138_v36 = vmov 0.0   ;;  %vm3139_vm1 = vmmov 0  }
  0x66   :  { %v2923_v27 = vld [vmem:[#allocation5 + $0xb8] ss:$28 sps:$4 sm:$0xff]   ;;  %v698_v28 = vunpack.c.l.s8.bf16 %v502_v24  ;;  %v2909_v30 = vld [vmem:[#allocation5 + $0xb0] ss:$28 sps:$4 sm:$0xff]   ;;  %v697_v31 = vunpack.c.l.s8.bf16 %v501_v29  ;;  %v705_v33 = vunpack.c.h.s8.bf16 %v502_v24  ;;  %v509_v34 = vld [vmem:[#allocation7 + $0x40] sm:$0xff]  ;;  %v704_v37 = vunpack.c.h.s8.bf16 %v501_v29 }
  0x67   :  { %406 = vmatpush1.bf16.msra.mxu0 %v2917_v18  ;;  %v2924_v32 = vld [vmem:[#allocation5 + $0x18] ss:$28 sps:$4 sm:$0xff]   ;;  %v2925_v38 = vld [vmem:[#allocation5 + $0x50] ss:$28 sps:$4 sm:$0xff]   ;;  %v712_v39 = vunpack.c.l.s8.bf16 %v509_v34  ;;  %v2926_v42 = vld [vmem:[#allocation5 + $0x88] ss:$28 sps:$4 sm:$0xff]   ;;  %v719_v43 = vunpack.c.h.s8.bf16 %v509_v34 }
  0x68   :  { %322 = vmatpush1.bf16.msra.mxu1 %v2896_v6  ;;  %407 = vmatprep.subr.bf16.mxu0 %v2918_v19  ;;  %v508_v35 = vld [vmem:[#allocation7 + $0x38] sm:$0xff]  ;;  %v515_v45 = vld [vmem:[#allocation7 + $0x70] sm:$0xff]  ;;  %v522_v56 = vld [vmem:[#allocation7 + $0xa8] sm:$0xff] }
  0x69   :  { %323 = vmatprep.subr.bf16.mxu1 %v2897_v7  ;;  %v711_v40 = vunpack.c.l.s8.bf16 %v508_v35  ;;  %v516_v41 = vld [vmem:[#allocation7 + $0x78] sm:$0xff]  ;;  %v718_v46 = vunpack.c.h.s8.bf16 %v508_v35  ;;  %v503_v49 = vld [vmem:[#allocation7 + $0x10] sm:$0xff]  ;;  %v725_v51 = vunpack.c.l.s8.bf16 %v515_v45  ;;  %v732_v58 = vunpack.c.h.s8.bf16 %v515_v45  ;;  %v510_v60 = vld [vmem:[#allocation7 + $0x48] sm:$0xff] }
  0x6a   :  { %v504_v44 = vld [vmem:[#allocation7 + $0x18] sm:$0xff]  ;;  %v726_v48 = vunpack.c.l.s8.bf16 %v516_v41  ;;  %v523_v52 = vld [vmem:[#allocation7 + $0xb0] sm:$0xff]  ;;  %v733_v53 = vunpack.c.h.s8.bf16 %v516_v41  ;;  %v699_v54 = vunpack.c.l.s8.bf16 %v503_v49  ;;  %v706_v61 = vunpack.c.h.s8.bf16 %v503_v49  ;;  %v530_v1 = vld [vmem:[#allocation7 + $0xe8] sm:$0xff] }
  0x6b   :  { %408 = vmatpush1.bf16.msra.mxu0 %v2920_v22  ;;  %v2927_v47 = vld [vmem:[#allocation5 + $0xc0] ss:$28 sps:$4 sm:$0xff]   ;;  %v700_v50 = vunpack.c.l.s8.bf16 %v504_v44  ;;  %v511_v55 = vld [vmem:[#allocation7 + $0x50] sm:$0xff]  ;;  %v707_v57 = vunpack.c.h.s8.bf16 %v504_v44  ;;  %v740_v59 = vunpack.c.l.s8.bf16 %v523_v52  ;;  %v739_v63 = vunpack.c.l.s8.bf16 %v522_v56  ;;  %v518_v4 = vld [vmem:[#allocation7 + $0x88] sm:$0xff] }
  0x6c   :  { %324 = vmatpush1.bf16.msra.mxu1 %v2899_v8  ;;  %409 = vmatprep.subr.bf16.mxu0 %v2921_v23  ;;  %v714_v62 = vunpack.c.l.s8.bf16 %v511_v55  ;;  %v747_v2 = vunpack.c.h.s8.bf16 %v523_v52  ;;  %v713_v3 = vunpack.c.l.s8.bf16 %v510_v60  ;;  %v529_v5 = vld [vmem:[#allocation7 + $0xe0] sm:$0xff]  ;;  %v721_v6 = vunpack.c.h.s8.bf16 %v511_v55  ;;  %v524_v23 = vld [vmem:[#allocation7 + $0xb8] sm:$0xff]  ;;  %v531_v35 = vld [vmem:[#allocation7 + $0xf0] sm:$0xff] }
  0x6d   :  { %360 = vmatprep.subr.bf16.mxu1 %v2902_v11  ;;  %v746_v7 = vunpack.c.h.s8.bf16 %v522_v56  ;;  %v754_v8 = vunpack.c.l.s8.bf16 %v530_v1  ;;  %v517_v9 = vld [vmem:[#allocation7 + $0x80] sm:$0xff]  ;;  %v720_v10 = vunpack.c.h.s8.bf16 %v510_v60  ;;  %v728_v11 = vunpack.c.l.s8.bf16 %v518_v4  ;;  %v538_v45 = vld [vmem:[#allocation7 + $0x128] sm:$0xff]  ;;  %v551_v55 = vld [vmem:[#allocation7 + $0x190] sm:$0xff] }
  0x6e   :  { %v753_v12 = vunpack.c.l.s8.bf16 %v529_v5  ;;  %v537_v13 = vld [vmem:[#allocation7 + $0x120] sm:$0xff]  ;;  %v761_v14 = vunpack.c.h.s8.bf16 %v530_v1  ;;  %v735_v18 = vunpack.c.h.s8.bf16 %v518_v4  ;;  %v760_v19 = vunpack.c.h.s8.bf16 %v529_v5  ;;  %v552_v60 = vld [vmem:[#allocation7 + $0x198] sm:$0xff]  ;;  %v558_v4 = vld [vmem:[#allocation7 + $0x1c8] sm:$0xff] }
  0x6f   :  { %2567 = vmatmul.mubr.msk.bf16.vlgmr.msra.gmra.mrb[0].mxu1 %vm313_vm0, %v3251_v15  ;;  %410 = vmatpush1.bf16.msra.mxu0 %v2923_v27  ;;  %v741_v27 = vunpack.c.l.s8.bf16 %v524_v23  ;;  %v776_v49 = vunpack.c.h.s8.bf16 %v538_v45  ;;  %v553_v56 = vld [vmem:[#allocation7 + $0x1a0] sm:$0xff]  ;;  %v560_v5 = vld [vmem:[#allocation7 + $0x1d8] sm:$0xff] }
  0x70   :  { %361 = vmatpush1.bf16.msra.mxu1 %v2900_v16  ;;  %392 = vmatprep.mubr.bf16.mxu1 %v3137_v0  ;;  %v525_v16 = vld [vmem:[#allocation7 + $0xc0] sm:$0xff]  ;;  %v805_v1 = vunpack.c.h.s8.bf16 %v553_v56 }
  0x71   :  { %362 = vmatprep.subr.bf16.mxu1 %v2905_v17  ;;  %1096 = vmatprep.subr.bf16.mxu0 %v698_v28  ;;  %v536_v17 = vld [vmem:[#allocation7 + $0x118] sm:$0xff]  ;;  %v742_v22 = vunpack.c.l.s8.bf16 %v525_v16  ;;  %v749_v28 = vunpack.c.h.s8.bf16 %v525_v16 }
  0x72   :  { %2569 = vmatmul.mubr.msk.bf16.vlgmr.msra.gmra.mrb[0].mxu0 %vm313_vm0, %v3251_v15  ;;  %v767_v24 = vunpack.c.l.s8.bf16 %v536_v17  ;;  %v774_v29 = vunpack.c.h.s8.bf16 %v536_v17 }
  0x73   :  { %1097 = vmatpush1.bf16.msra.mxu0 %v697_v31 }
  0x74   :  { %363 = vmatpush1.bf16.msra.mxu1 %v2903_v20  ;;  %1098 = vmatprep.subr.bf16.mxu0 %v705_v33  ;;  %v768_v20 = vunpack.c.l.s8.bf16 %v537_v13  ;;  %v748_v33 = vunpack.c.h.s8.bf16 %v524_v23 }
  0x75   :  { %364 = vmatprep.subr.bf16.mxu1 %v2908_v21  ;;  %v734_v21 = vunpack.c.h.s8.bf16 %v517_v9 }
  0x77   :  { %1099 = vmatpush1.bf16.msra.mxu0 %v704_v37 }
  0x78   :  { %365 = vmatpush1.bf16.msra.mxu1 %v2906_v25  ;;  %1100 = vmatprep.subr.bf16.mxu0 %v712_v39  ;;  %v775_v25 = vunpack.c.h.s8.bf16 %v537_v13  ;;  %v755_v39 = vunpack.c.l.s8.bf16 %v531_v35 }
  0x79   :  { %366 = vmatprep.subr.bf16.mxu1 %v2911_v26  ;;  %v544_v26 = vld [vmem:[#allocation7 + $0x158] sm:$0xff] }
  0x7a   :  { %v782_v31 = vunpack.c.l.s8.bf16 %v544_v26 }
  0x7b   :  { %1101 = vmatpush1.bf16.msra.mxu0 %v711_v40 }
  0x7c   :  { %367 = vmatpush1.bf16.msra.mxu1 %v2909_v30  ;;  %1102 = vmatprep.subr.bf16.mxu0 %v719_v43  ;;  %v532_v30 = vld [vmem:[#allocation7 + $0xf8] sm:$0xff]  ;;  %v762_v43 = vunpack.c.h.s8.bf16 %v531_v35  ;;  %v817_v35 = vunpack.c.h.s8.bf16 %v558_v4 }
  0x7d   :  { %2783 = vmatprep.subr.bf16.mxu1 %v3138_v36  ;;  %v756_v34 = vunpack.c.l.s8.bf16 %v532_v30  ;;  %v763_v40 = vunpack.c.h.s8.bf16 %v532_v30 }
  0x7f   :  { %2568 = vmatmul.mubr.msk.bf16.vlgmr.msra.gmra.mrb[4].mxu1 %vm313_vm0, %v3251_v15  ;;  %1103 = vmatpush1.bf16.msra.mxu0 %v718_v46  ;;  %v769_v46 = vunpack.c.l.s8.bf16 %v538_v45 }
  0x80   :  { %2784 = vmatpush3.bf16.msra.mxu1 %v2924_v32  ;;  %2791 = vmatprep.mubr.msk.bf16.mxu1 %vm3139_vm1, %v3138_v36  ;;  %v543_v32 = vld [vmem:[#allocation7 + $0x150] sm:$0xff] }
  0x81   :  { %2785 = vmatprep.subr.bf16.mxu1 %v3138_v36  ;;  %1104 = vmatprep.subr.bf16.mxu0 %v726_v48  ;;  %v781_v37 = vunpack.c.l.s8.bf16 %v543_v32  ;;  %v788_v41 = vunpack.c.h.s8.bf16 %v543_v32  ;;  %v546_v48 = vld [vmem:[#allocation7 + $0x168] sm:$0xff] }
  0x83   :  { %1105 = vmatpush1.bf16.msra.mxu0 %v725_v51  ;;  %v545_v51 = vld [vmem:[#allocation7 + $0x160] sm:$0xff] }
  0x84   :  { %2786 = vmatpush3.bf16.msra.mxu1 %v2925_v38  ;;  %1106 = vmatprep.subr.bf16.mxu0 %v733_v53  ;;  %v789_v38 = vunpack.c.h.s8.bf16 %v544_v26  ;;  %v783_v52 = vunpack.c.l.s8.bf16 %v545_v51  ;;  %v791_v53 = vunpack.c.h.s8.bf16 %v546_v48  ;;  %v559_v26 = vld [vmem:[#allocation7 + $0x1d0] sm:$0xff] }
  0x85   :  { %2787 = vmatprep.subr.bf16.mxu1 %v3138_v36  ;;  %v818_v45 = vunpack.c.h.s8.bf16 %v559_v26 }
  0x87   :  { %1107 = vmatpush1.bf16.msra.mxu0 %v732_v58  ;;  %v798_v58 = vunpack.c.l.s8.bf16 %v553_v56 }
  0x88   :  { %2788 = vmatpush3.bf16.msra.mxu1 %v2926_v42  ;;  %1108 = vmatprep.subr.bf16.mxu0 %v740_v59  ;;  %v539_v42 = vld [vmem:[#allocation7 + $0x130] sm:$0xff]  ;;  %v550_v59 = vld [vmem:[#allocation7 + $0x188] sm:$0xff] }
  0x89   :  { %2789 = vmatprep.subr.bf16.mxu1 %v3138_v36  ;;  %v770_v44 = vunpack.c.l.s8.bf16 %v539_v42 }
  0x8b   :  { %1109 = vmatpush1.bf16.msra.mxu0 %v739_v63  ;;  %v803_v63 = vunpack.c.h.s8.bf16 %v551_v55 }
  0x8c   :  { %2790 = vmatpush3.bf16.msra.mxu1 %v2927_v47  ;;  %1110 = vmatprep.subr.bf16.mxu0 %v747_v2  ;;  %v777_v47 = vunpack.c.h.s8.bf16 %v539_v42  ;;  %v802_v2 = vunpack.c.h.s8.bf16 %v550_v59 }
  0x8d   :  { %1268 = vmatprep.subr.bf16.mxu1 %v700_v50  ;;  %v784_v50 = vunpack.c.l.s8.bf16 %v546_v48 }
  0x8f   :  { %2792 = vmatmul.mubr.msk.bf16.vlgmr.msra.gmra.mrb[8].mxu1 %vm313_vm0, %v3251_v15  ;;  %1111 = vmatpush1.bf16.msra.mxu0 %v746_v7  ;;  %v727_v15 = vunpack.c.l.s8.bf16 %v517_v9  ;;  %v812_v7 = vunpack.c.l.s8.bf16 %v560_v5 }
  0x90   :  { %1269 = vmatpush1.bf16.msra.mxu1 %v699_v54  ;;  %1112 = vmatprep.subr.bf16.mxu0 %v754_v8  ;;  %v790_v54 = vunpack.c.h.s8.bf16 %v545_v51  ;;  %v134_v8 = vlaneseq }
  0x91   :  { %1270 = vmatprep.subr.bf16.mxu1 %v707_v57  ;;  %v796_v57 = vunpack.c.l.s8.bf16 %v551_v55 }
  0x92   :  { %v3268_v9 = vshrl.u32 %v134_v8, 7 }
  0x93   :  { %1113 = vmatpush1.bf16.msra.mxu0 %v753_v12 }
  0x94   :  { %1271 = vmatpush1.bf16.msra.mxu1 %v706_v61  ;;  %1114 = vmatprep.subr.bf16.mxu0 %v761_v14  ;;  %v795_v61 = vunpack.c.l.s8.bf16 %v550_v59  ;;  %v3279_v12 = vsub.s32 1, %v3268_v9 }
  0x95   :  { %1272 = vmatprep.subr.bf16.mxu1 %v714_v62  ;;  %v797_v62 = vunpack.c.l.s8.bf16 %v552_v60 }
  0x97   :  { %1115 = vmatpush1.bf16.msra.mxu0 %v760_v19 }
  0x98   :  { %1273 = vmatpush1.bf16.msra.mxu1 %v713_v3  ;;  %1116 = vmatprep.subr.bf16.mxu0 %v768_v20  ;;  %v804_v3 = vunpack.c.h.s8.bf16 %v552_v60 }
  0x99   :  { %1274 = vmatprep.subr.bf16.mxu1 %v721_v6  ;;  %v810_v6 = vunpack.c.l.s8.bf16 %v558_v4 }
  0x9b   :  { %1117 = vmatpush1.bf16.msra.mxu0 %v767_v24 }
  0x9c   :  { %1275 = vmatpush1.bf16.msra.mxu1 %v720_v10  ;;  %1118 = vmatprep.subr.bf16.mxu0 %v775_v25  ;;  %v3271_v10 = vsub.s32 0, %v3268_v9  ;;  %v557_v25 = vld [vmem:[#allocation7 + $0x1c0] sm:$0xff] }
  0x9d   :  { %1276 = vmatprep.subr.bf16.mxu1 %v728_v11  ;;  %v3276_v11 = vld [vmem:[%s3433_s2] sm:$0xff] }
  0x9e   :  { %v137_v13 = vrot.slane %v3276_v11, %v3271_v10  ;;  %v141_v14 = vrot.slane %v3276_v11, %v3279_v12 }
  0x9f   :  { %1119 = vmatpush1.bf16.msra.mxu0 %v774_v29  ;;  %v3286_v29 = vsub.s32 4, %v3268_v9 }
  0xa0   :  { %1277 = vmatpush1.bf16.msra.mxu1 %v727_v15  ;;  %1120 = vmatprep.subr.bf16.mxu0 %v782_v31  ;;  %v3291_v31 = vsub.s32 5, %v3268_v9 }
  0xa1   :  { %1278 = vmatprep.subr.bf16.mxu1 %v735_v18  ;;  %v153_v42 = vrot.slane %v3276_v11, %v3286_v29 }
  0xa3   :  { %1121 = vmatpush1.bf16.msra.mxu0 %v781_v37  ;;  %v819_v37 = vunpack.c.h.s8.bf16 %v560_v5 }
  0xa4   :  { %1279 = vmatpush1.bf16.msra.mxu1 %v734_v21  ;;  %1122 = vmatprep.subr.bf16.mxu0 %v789_v38  ;;  %v3296_v38 = vsub.s32 2, %v3268_v9 }
  0xa5   :  { %1280 = vmatprep.subr.bf16.mxu1 %v742_v22 }
  0xa7   :  { %1123 = vmatpush1.bf16.msra.mxu0 %v788_v41  ;;  %v3301_v41 = vsub.s32 3, %v3268_v9 }
  0xa8   :  { %1281 = vmatpush1.bf16.msra.mxu1 %v741_v27  ;;  %1124 = vmatprep.subr.bf16.mxu0 %v796_v57 }
  0xa9   :  { %1282 = vmatprep.subr.bf16.mxu1 %v749_v28 }
  0xab   :  { %1125 = vmatpush1.bf16.msra.mxu0 %v795_v61 }
  0xac   :  { %1283 = vmatpush1.bf16.msra.mxu1 %v748_v33  ;;  %1126 = vmatprep.subr.bf16.mxu0 %v803_v63  ;;  %v809_v33 = vunpack.c.l.s8.bf16 %v557_v25 }
  0xad   :  { %1284 = vmatprep.subr.bf16.mxu1 %v756_v34  ;;  %v811_v34 = vunpack.c.l.s8.bf16 %v559_v26  ;;  %v571_v26 = vld [vmem:[#allocation7 + $0x230] sm:$0xff] }
  0xaf   :  { %1127 = vmatpush1.bf16.msra.mxu0 %v802_v2 }
  0xb0   :  { %1285 = vmatpush1.bf16.msra.mxu1 %v755_v39  ;;  %1139 = vmatprep.subr.bf16.mxu0 %v810_v6  ;;  %v565_v39 = vld [vmem:[#allocation7 + $0x200] sm:$0xff]  ;;  %v572_v6 = vld [vmem:[#allocation7 + $0x238] sm:$0xff] }
  0xb1   :  { %1286 = vmatprep.subr.bf16.mxu1 %v763_v40  ;;  %v567_v40 = vld [vmem:[#allocation7 + $0x210] sm:$0xff]  ;;  %v831_v59 = vunpack.c.h.s8.bf16 %v565_v39 }
  0xb2   :  { %v826_v48 = vunpack.c.l.s8.bf16 %v567_v40 }
  0xb4   :  { %1287 = vmatpush1.bf16.msra.mxu1 %v762_v43  ;;  %v157_v43 = vrot.slane %v3276_v11, %v3291_v31 }
  0xb5   :  { %1288 = vmatprep.subr.bf16.mxu1 %v770_v44  ;;  %v816_v44 = vunpack.c.h.s8.bf16 %v557_v25 }
  0xb8   :  { %1289 = vmatpush1.bf16.msra.mxu1 %v769_v46  ;;  %v564_v46 = vld [vmem:[#allocation7 + $0x1f8] sm:$0xff] }
  0xb9   :  { %1290 = vmatprep.subr.bf16.mxu1 %v777_v47  ;;  %v824_v47 = vunpack.c.l.s8.bf16 %v565_v39  ;;  %v823_v55 = vunpack.c.l.s8.bf16 %v564_v46 }
  0xbc   :  { %1291 = vmatpush1.bf16.msra.mxu1 %v776_v49  ;;  %v566_v49 = vld [vmem:[#allocation7 + $0x208] sm:$0xff] }
  0xbd   :  { %1292 = vmatprep.subr.bf16.mxu1 %v784_v50  ;;  %v145_v50 = vrot.slane %v3276_v11, %v3296_v38 }
  0xc0   :  { %1293 = vmatpush1.bf16.msra.mxu1 %v783_v52  ;;  %v149_v52 = vrot.slane %v3276_v11, %v3301_v41 }
  0xc1   :  { %1294 = vmatprep.subr.bf16.mxu1 %v791_v53 }
  0xc4   :  { %1295 = vmatpush1.bf16.msra.mxu1 %v790_v54 }
  0xc5   :  { %1296 = vmatprep.subr.bf16.mxu1 %v798_v58  ;;  %v825_v58 = vunpack.c.l.s8.bf16 %v566_v49 }
  0xc8   :  { %1297 = vmatpush1.bf16.msra.mxu1 %v797_v62 }
  0xc9   :  { %1298 = vmatprep.subr.bf16.mxu1 %v805_v1  ;;  %v833_v1 = vunpack.c.h.s8.bf16 %v567_v40 }
  0xcc   :  { %1299 = vmatpush1.bf16.msra.mxu1 %v804_v3 }
  0xcd   :  { %1311 = vmatprep.subr.bf16.mxu1 %v812_v7  ;;  %v574_v7 = vld [vmem:[#allocation7 + $0x248] sm:$0xff] }
  0xce   :  { %v840_v25 = vunpack.c.l.s8.bf16 %v574_v7 }
 0x142   :  { %v351_v15 = vpop.f32.mrb[0].mxu1 }
 0x143   :  { %v352_v16 = vadd.f32 %v351_v15, %v137_v13  ;;  %v353_v17 = vpop.f32.mrb[1].mxu1  ;;  %v830_v15 = vunpack.c.h.s8.bf16 %v564_v46  ;;  %v844_v46 = vunpack.c.h.s8.bf16 %v571_v26 }
 0x144   :  { %v354_v18 = vadd.f32 %v353_v17, %v141_v14  ;;  %v355_v19 = vpop.f32.mrb[2].mxu1 }
 0x145   :  { %v356_v20 = vadd.f32 %v355_v19, %v137_v13  ;;  %v357_v21 = vpop.f32.mrb[3].mxu1  ;;  %v487_v23 = vmax.f32 %v352_v16, 0.0  ;;  %v437_v51 = vpop.f32.mrb[0].mxu0 }
 0x146   :  { %v358_v22 = vadd.f32 %v357_v21, %v141_v14  ;;  %v488_v27 = vmax.f32 %v354_v18, 0.0  ;;  %v438_v53 = vadd.f32 %v437_v51, %v153_v42  ;;  %v439_v54 = vpop.f32.mrb[1].mxu0  ;;  %v580_v51 = vld [vmem:[#allocation7 + $0x278] sm:$0xff] }
 0x147   :  { %v494_v24 = vmax.f32 %v356_v20, 0.0  ;;  %v440_v56 = vadd.f32 %v439_v54, %v157_v43  ;;  %v441_v57 = vpop.f32.mrb[2].mxu0  ;;  %v832_v20 = vunpack.c.h.s8.bf16 %v566_v49 }
 0x148   :  { %v495_v28 = vmax.f32 %v358_v22, 0.0  ;;  %v491_v61 = vmax.f32 %v438_v53, 0.0  ;;  %v442_v62 = vadd.f32 %v441_v57, %v153_v42  ;;  %v443_v63 = vpop.f32.mrb[3].mxu0  ;;  %v845_v42 = vunpack.c.h.s8.bf16 %v572_v6 }
 0x149   :  { %v3288_v30 = vpack.c.bf16 %v494_v24, %v487_v23  ;;  %v492_v4 = vmax.f32 %v440_v56, 0.0  ;;  %v444_v5 = vadd.f32 %v443_v63, %v157_v43  ;;  %v838_v24 = vunpack.c.l.s8.bf16 %v572_v6  ;;  %v585_v6 = vld [vmem:[#allocation7 + $0x2a0] sm:$0xff] }
 0x14a   :  { %v3293_v32 = vpack.c.bf16 %v495_v28, %v488_v27  ;;  %v498_v14 = vmax.f32 %v442_v62, 0.0  ;;  %v573_v27 = vld [vmem:[#allocation7 + $0x240] sm:$0xff]  ;;  %v847_v43 = vunpack.c.h.s8.bf16 %v574_v7  ;;  %v588_v62 = vld [vmem:[#allocation7 + $0x2b8] sm:$0xff]  ;;  %v587_v7 = vld [vmem:[#allocation7 + $0x2b0] sm:$0xff] }
 0x14b   :  { %v499_v19 = vmax.f32 %v444_v5, 0.0  ;;  %v839_v39 = vunpack.c.l.s8.bf16 %v573_v27  ;;  %v868_v5 = vunpack.c.l.s8.bf16 %v588_v62 }
 0x14c   :  { %1128 = vmatprep.mubr.bf16.mxu0 %v3293_v32  ;;  %1300 = vmatprep.mubr.bf16.mxu1 %v3293_v32  ;;  %v3313_v23 = vpack.c.bf16 %v498_v14, %v491_v61  ;;  %v586_v61 = vld [vmem:[#allocation7 + $0x2a8] sm:$0xff]  ;;  %v865_v14 = vunpack.c.l.s8.bf16 %v585_v6 }
 0x14d   :  { %1129 = vmatmul.mubr.bf16.vlgmr.msra.gmra.mrb[4].mxu0 %v3288_v30  ;;  %1301 = vmatmul.mubr.bf16.vlgmr.msra.gmra.mrb[12].mxu1 %v3288_v30 }
 0x14e   :  { %1140 = vmatpush1.bf16.msra.mxu0 %v809_v33  ;;  %1312 = vmatpush1.bf16.msra.mxu1 %v811_v34  ;;  %v3315_v33 = vpack.c.bf16 %v499_v19, %v492_v4  ;;  %v866_v4 = vunpack.c.l.s8.bf16 %v586_v61  ;;  %v595_v19 = vld [vmem:[#allocation7 + $0x2f0] sm:$0xff] }
 0x14f   :  { %1141 = vmatprep.subr.bf16.mxu0 %v817_v35  ;;  %1313 = vmatprep.subr.bf16.mxu1 %v819_v37  ;;  %v837_v37 = vunpack.c.l.s8.bf16 %v571_v26  ;;  %v594_v26 = vld [vmem:[#allocation7 + $0x2e8] sm:$0xff] }
 0x152   :  { %1142 = vmatpush1.bf16.msra.mxu0 %v816_v44  ;;  %1314 = vmatpush1.bf16.msra.mxu1 %v818_v45  ;;  %v394_v60 = vpop.f32.mrb[4].mxu1  ;;  %v579_v44 = vld [vmem:[#allocation7 + $0x270] sm:$0xff]  ;;  %v581_v45 = vld [vmem:[#allocation7 + $0x280] sm:$0xff] }
 0x153   :  { %1143 = vmatprep.subr.bf16.mxu0 %v824_v47  ;;  %1315 = vmatprep.subr.bf16.mxu1 %v826_v48  ;;  %v395_v2 = vadd.f32 %v394_v60, %v145_v50  ;;  %v396_v3 = vpop.f32.mrb[5].mxu1  ;;  %v846_v47 = vunpack.c.h.s8.bf16 %v573_v27  ;;  %v852_v48 = vunpack.c.l.s8.bf16 %v579_v44  ;;  %v854_v49 = vunpack.c.l.s8.bf16 %v581_v45 }
 0x154   :  { %v397_v8 = vadd.f32 %v396_v3, %v149_v52  ;;  %v398_v13 = vpop.f32.mrb[6].mxu1  ;;  %v859_v57 = vunpack.c.h.s8.bf16 %v579_v44  ;;  %v860_v3 = vunpack.c.h.s8.bf16 %v580_v51  ;;  %v888_v44 = vunpack.c.h.s8.bf16 %v594_v26 }
 0x155   :  { %v489_v16 = vmax.f32 %v395_v2, 0.0  ;;  %v399_v17 = vadd.f32 %v398_v13, %v145_v50  ;;  %v400_v18 = vpop.f32.mrb[7].mxu1  ;;  %v578_v50 = vld [vmem:[#allocation7 + $0x268] sm:$0xff] }
 0x156   :  { %1144 = vmatpush1.bf16.msra.mxu0 %v823_v55  ;;  %1316 = vmatpush1.bf16.msra.mxu1 %v825_v58  ;;  %v490_v21 = vmax.f32 %v397_v8, 0.0  ;;  %v401_v22 = vadd.f32 %v400_v18, %v149_v52  ;;  %v3324_v52 = vsub.s32 6, %v3268_v9  ;;  %v851_v54 = vunpack.c.l.s8.bf16 %v578_v50  ;;  %v593_v18 = vld [vmem:[#allocation7 + $0x2e0] sm:$0xff] }
 0x157   :  { %1145 = vmatprep.subr.bf16.mxu0 %v831_v59  ;;  %1317 = vmatprep.subr.bf16.mxu1 %v833_v1  ;;  %v496_v28 = vmax.f32 %v399_v17, 0.0  ;;  %v853_v55 = vunpack.c.l.s8.bf16 %v580_v51  ;;  %v861_v58 = vunpack.c.h.s8.bf16 %v581_v45  ;;  %v875_v17 = vunpack.c.h.s8.bf16 %v588_v62 }
 0x158   :  { %v497_v34 = vmax.f32 %v401_v22, 0.0  ;;  %v161_v53 = vrot.slane %v3276_v11, %v3324_v52  ;;  %v858_v11 = vunpack.c.h.s8.bf16 %v578_v50  ;;  %v880_v22 = vunpack.c.l.s8.bf16 %v593_v18 }
 0x159   :  { %v3317_v35 = vpack.c.bf16 %v496_v28, %v489_v16  ;;  %v873_v16 = vunpack.c.h.s8.bf16 %v586_v61  ;;  %v881_v28 = vunpack.c.l.s8.bf16 %v594_v26  ;;  %v608_v61 = vld [vmem:[#allocation7 + $0x358] sm:$0xff]  ;;  %v622_v26 = vld [vmem:[#allocation7 + $0x3c8] sm:$0xff] }
 0x15a   :  { %1146 = vmatpush1.bf16.msra.mxu0 %v830_v15  ;;  %1318 = vmatpush1.bf16.msra.mxu1 %v832_v20  ;;  %v3319_v40 = vpack.c.bf16 %v497_v34, %v490_v21  ;;  %v867_v15 = vunpack.c.l.s8.bf16 %v587_v7  ;;  %v872_v20 = vunpack.c.h.s8.bf16 %v585_v6  ;;  %v874_v21 = vunpack.c.h.s8.bf16 %v587_v7  ;;  %v613_v7 = vld [vmem:[#allocation7 + $0x380] sm:$0xff] }
 0x15b   :  { %1147 = vmatprep.subr.bf16.mxu0 %v838_v24  ;;  %1319 = vmatprep.subr.bf16.mxu1 %v840_v25  ;;  %v882_v24 = vunpack.c.l.s8.bf16 %v595_v19  ;;  %v592_v25 = vld [vmem:[#allocation7 + $0x2d8] sm:$0xff]  ;;  %v887_v34 = vunpack.c.h.s8.bf16 %v593_v18  ;;  %v621_v18 = vld [vmem:[#allocation7 + $0x3c0] sm:$0xff] }
 0x15c   :  { %1171 = vmatprep.mubr.bf16.mxu0 %v3319_v40  ;;  %1343 = vmatprep.mubr.bf16.mxu1 %v3319_v40  ;;  %v879_v27 = vunpack.c.l.s8.bf16 %v592_v25 }
 0x15e   :  { %1148 = vmatpush1.bf16.msra.mxu0 %v837_v37  ;;  %1320 = vmatpush1.bf16.msra.mxu1 %v839_v39  ;;  %v889_v37 = vunpack.c.h.s8.bf16 %v595_v19  ;;  %v600_v39 = vld [vmem:[#allocation7 + $0x318] sm:$0xff]  ;;  %v623_v19 = vld [vmem:[#allocation7 + $0x3d0] sm:$0xff] }
 0x15f   :  { %1149 = vmatprep.subr.bf16.mxu0 %v845_v42  ;;  %1321 = vmatprep.subr.bf16.mxu1 %v847_v43  ;;  %v602_v42 = vld [vmem:[#allocation7 + $0x328] sm:$0xff]  ;;  %v886_v43 = vunpack.c.h.s8.bf16 %v592_v25  ;;  %v894_v45 = vunpack.c.l.s8.bf16 %v600_v39  ;;  %v901_v51 = vunpack.c.h.s8.bf16 %v600_v39  ;;  %v620_v25 = vld [vmem:[#allocation7 + $0x3b8] sm:$0xff] }
 0x160   :  { %v628_v39 = vld [vmem:[#allocation7 + $0x3f8] sm:$0xff] }
 0x162   :  { %1150 = vmatpush1.bf16.msra.mxu0 %v844_v46  ;;  %1322 = vmatpush1.bf16.msra.mxu1 %v846_v47  ;;  %v480_v56 = vpop.f32.mrb[8].mxu1  ;;  %v896_v46 = vunpack.c.l.s8.bf16 %v602_v42  ;;  %v599_v47 = vld [vmem:[#allocation7 + $0x310] sm:$0xff] }
 0x163   :  { %1151 = vmatprep.subr.bf16.mxu0 %v852_v48  ;;  %1323 = vmatprep.subr.bf16.mxu1 %v854_v49  ;;  %v481_v59 = vadd.f32 %v480_v56, %v161_v53  ;;  %v2793_v60 = vpop.f32.mrb[9].mxu1  ;;  %v601_v48 = vld [vmem:[#allocation7 + $0x320] sm:$0xff]  ;;  %v893_v49 = vunpack.c.l.s8.bf16 %v599_v47  ;;  %v900_v56 = vunpack.c.h.s8.bf16 %v599_v47  ;;  %v627_v47 = vld [vmem:[#allocation7 + $0x3f0] sm:$0xff] }
 0x164   :  { %v483_v63 = vpop.f32.mrb[10].mxu1  ;;  %v895_v50 = vunpack.c.l.s8.bf16 %v601_v48  ;;  %v606_v60 = vld [vmem:[#allocation7 + $0x348] sm:$0xff] }
 0x165   :  { %v493_v1 = vmax.f32 %v481_v59, 0.0  ;;  %v484_v9 = vadd.f32 %v483_v63, %v161_v53  ;;  %v2794_v2 = vpop.f32.mrb[11].mxu1  ;;  %v903_v53 = vunpack.c.h.s8.bf16 %v602_v42  ;;  %v907_v62 = vunpack.c.l.s8.bf16 %v606_v60  ;;  %v630_v42 = vld [vmem:[#allocation7 + $0x408] sm:$0xff] }
 0x166   :  { %1152 = vmatpush1.bf16.msra.mxu0 %v851_v54  ;;  %1324 = vmatpush1.bf16.msra.mxu1 %v853_v55  ;;  %v607_v54 = vld [vmem:[#allocation7 + $0x350] sm:$0xff]  ;;  %v609_v55 = vld [vmem:[#allocation7 + $0x360] sm:$0xff]  ;;  %v909_v63 = vunpack.c.l.s8.bf16 %v608_v61  ;;  %v614_v2 = vld [vmem:[#allocation7 + $0x388] sm:$0xff] }
 0x167   :  { %1153 = vmatprep.subr.bf16.mxu0 %v859_v57  ;;  %1325 = vmatprep.subr.bf16.mxu1 %v861_v58  ;;  %v500_v8 = vmax.f32 %v484_v9, 0.0  ;;  %v902_v57 = vunpack.c.h.s8.bf16 %v601_v48  ;;  %v908_v58 = vunpack.c.l.s8.bf16 %v607_v54  ;;  %v910_v59 = vunpack.c.l.s8.bf16 %v609_v55  ;;  %v629_v48 = vld [vmem:[#allocation7 + $0x400] sm:$0xff] }
 0x168   :  { %v917_v9 = vunpack.c.h.s8.bf16 %v609_v55  ;;  %v637_v55 = vld [vmem:[#allocation7 + $0x440] sm:$0xff] }
 0x169   :  { %v3328_v13 = vpack.c.bf16 %v500_v8, %v493_v1  ;;  %v915_v1 = vunpack.c.h.s8.bf16 %v607_v54  ;;  %v615_v8 = vld [vmem:[#allocation7 + $0x390] sm:$0xff] }
 0x16a   :  { %1154 = vmatpush1.bf16.msra.mxu0 %v858_v11  ;;  %1326 = vmatpush1.bf16.msra.mxu1 %v860_v3  ;;  %v616_v11 = vld [vmem:[#allocation7 + $0x398] sm:$0xff]  ;;  %v914_v3 = vunpack.c.h.s8.bf16 %v606_v60  ;;  %v635_v54 = vld [vmem:[#allocation7 + $0x430] sm:$0xff]  ;;  %v634_v60 = vld [vmem:[#allocation7 + $0x428] sm:$0xff] }
 0x16b   :  { %1155 = vmatprep.subr.bf16.mxu0 %v866_v4  ;;  %1327 = vmatprep.subr.bf16.mxu1 %v868_v5  ;;  %v916_v4 = vunpack.c.h.s8.bf16 %v608_v61  ;;  %v922_v5 = vunpack.c.l.s8.bf16 %v614_v2  ;;  %v924_v6 = vunpack.c.l.s8.bf16 %v616_v11  ;;  %v636_v61 = vld [vmem:[#allocation7 + $0x438] sm:$0xff] }
 0x16e   :  { %1156 = vmatpush1.bf16.msra.mxu0 %v865_v14  ;;  %1328 = vmatpush1.bf16.msra.mxu1 %v867_v15  ;;  %v921_v14 = vunpack.c.l.s8.bf16 %v613_v7  ;;  %v923_v15 = vunpack.c.l.s8.bf16 %v615_v8 }
 0x16f   :  { %1157 = vmatprep.subr.bf16.mxu0 %v873_v16  ;;  %1329 = vmatprep.subr.bf16.mxu1 %v875_v17  ;;  %v929_v16 = vunpack.c.h.s8.bf16 %v614_v2  ;;  %v931_v17 = vunpack.c.h.s8.bf16 %v616_v11  ;;  %v642_v2 = vld [vmem:[#allocation7 + $0x468] sm:$0xff]  ;;  %v644_v11 = vld [vmem:[#allocation7 + $0x478] sm:$0xff] }
 0x172   :  { %1158 = vmatpush1.bf16.msra.mxu0 %v872_v20  ;;  %1330 = vmatpush1.bf16.msra.mxu1 %v874_v21  ;;  %v928_v20 = vunpack.c.h.s8.bf16 %v613_v7  ;;  %v930_v21 = vunpack.c.h.s8.bf16 %v615_v8  ;;  %v641_v7 = vld [vmem:[#allocation7 + $0x460] sm:$0xff]  ;;  %v643_v8 = vld [vmem:[#allocation7 + $0x470] sm:$0xff] }
 0x173   :  { %1159 = vmatprep.subr.bf16.mxu0 %v880_v22  ;;  %1331 = vmatprep.subr.bf16.mxu1 %v882_v24  ;;  %v936_v22 = vunpack.c.l.s8.bf16 %v621_v18  ;;  %v938_v24 = vunpack.c.l.s8.bf16 %v623_v19 }
 0x176   :  { %1160 = vmatpush1.bf16.msra.mxu0 %v879_v27  ;;  %1332 = vmatpush1.bf16.msra.mxu1 %v881_v28  ;;  %v935_v27 = vunpack.c.l.s8.bf16 %v620_v25  ;;  %v937_v28 = vunpack.c.l.s8.bf16 %v622_v26 }
 0x177   :  { %1161 = vmatprep.subr.bf16.mxu0 %v887_v34  ;;  %1333 = vmatprep.subr.bf16.mxu1 %v889_v37  ;;  %v943_v34 = vunpack.c.h.s8.bf16 %v621_v18  ;;  %v945_v37 = vunpack.c.h.s8.bf16 %v623_v19  ;;  %v649_v18 = vld [vmem:[#allocation7 + $0x4a0] sm:$0xff]  ;;  %v651_v19 = vld [vmem:[#allocation7 + $0x4b0] sm:$0xff] }
 0x17a   :  { %1162 = vmatpush1.bf16.msra.mxu0 %v886_v43  ;;  %1334 = vmatpush1.bf16.msra.mxu1 %v888_v44  ;;  %v942_v43 = vunpack.c.h.s8.bf16 %v620_v25  ;;  %v944_v44 = vunpack.c.h.s8.bf16 %v622_v26  ;;  %v648_v25 = vld [vmem:[#allocation7 + $0x498] sm:$0xff]  ;;  %v650_v26 = vld [vmem:[#allocation7 + $0x4a8] sm:$0xff] }
 0x17b   :  { %1163 = vmatprep.subr.bf16.mxu0 %v894_v45  ;;  %1335 = vmatprep.subr.bf16.mxu1 %v896_v46  ;;  %v950_v45 = vunpack.c.l.s8.bf16 %v628_v39  ;;  %v952_v46 = vunpack.c.l.s8.bf16 %v630_v42 }
 0x17e   :  { %1164 = vmatpush1.bf16.msra.mxu0 %v893_v49  ;;  %1336 = vmatpush1.bf16.msra.mxu1 %v895_v50  ;;  %v949_v49 = vunpack.c.l.s8.bf16 %v627_v47  ;;  %v951_v50 = vunpack.c.l.s8.bf16 %v629_v48 }
 0x17f   :  { %1165 = vmatprep.subr.bf16.mxu0 %v901_v51  ;;  %1337 = vmatprep.subr.bf16.mxu1 %v903_v53  ;;  %v957_v51 = vunpack.c.h.s8.bf16 %v628_v39  ;;  %v959_v53 = vunpack.c.h.s8.bf16 %v630_v42  ;;  %v656_v39 = vld [vmem:[#allocation7 + $0x4d8] sm:$0xff]  ;;  %v658_v42 = vld [vmem:[#allocation7 + $0x4e8] sm:$0xff] }
 0x182   :  { %1166 = vmatpush1.bf16.msra.mxu0 %v900_v56  ;;  %1338 = vmatpush1.bf16.msra.mxu1 %v902_v57  ;;  %v956_v56 = vunpack.c.h.s8.bf16 %v627_v47  ;;  %v958_v57 = vunpack.c.h.s8.bf16 %v629_v48  ;;  %v655_v47 = vld [vmem:[#allocation7 + $0x4d0] sm:$0xff]  ;;  %v657_v48 = vld [vmem:[#allocation7 + $0x4e0] sm:$0xff] }
 0x183   :  { %1167 = vmatprep.subr.bf16.mxu0 %v908_v58  ;;  %1339 = vmatprep.subr.bf16.mxu1 %v910_v59  ;;  %v964_v58 = vunpack.c.l.s8.bf16 %v635_v54  ;;  %v966_v59 = vunpack.c.l.s8.bf16 %v637_v55 }
 0x186   :  { %1168 = vmatpush1.bf16.msra.mxu0 %v907_v62  ;;  %1340 = vmatpush1.bf16.msra.mxu1 %v909_v63  ;;  %v963_v62 = vunpack.c.l.s8.bf16 %v634_v60  ;;  %v965_v63 = vunpack.c.l.s8.bf16 %v636_v61 }
 0x187   :  { %1169 = vmatprep.subr.bf16.mxu0 %v915_v1  ;;  %1341 = vmatprep.subr.bf16.mxu1 %v917_v9  ;;  %v971_v1 = vunpack.c.h.s8.bf16 %v635_v54  ;;  %v973_v9 = vunpack.c.h.s8.bf16 %v637_v55  ;;  %v663_v54 = vld [vmem:[#allocation7 + $0x510] sm:$0xff]  ;;  %v665_v55 = vld [vmem:[#allocation7 + $0x520] sm:$0xff] }
 0x18a   :  { %1170 = vmatpush1.bf16.msra.mxu0 %v914_v3  ;;  %1342 = vmatpush1.bf16.msra.mxu1 %v916_v4  ;;  %v970_v3 = vunpack.c.h.s8.bf16 %v634_v60  ;;  %v972_v4 = vunpack.c.h.s8.bf16 %v636_v61  ;;  %v662_v60 = vld [vmem:[#allocation7 + $0x508] sm:$0xff]  ;;  %v664_v61 = vld [vmem:[#allocation7 + $0x518] sm:$0xff] }
 0x18b   :  { %1182 = vmatprep.subr.bf16.mxu0 %v922_v5  ;;  %1354 = vmatprep.subr.bf16.mxu1 %v924_v6  ;;  %v978_v5 = vunpack.c.l.s8.bf16 %v642_v2  ;;  %v980_v6 = vunpack.c.l.s8.bf16 %v644_v11 }
 0x18d   :  { %1172 = vmatmul.mubr.bf16.vlgmr.msra.gmra.mrb[4].mxu0 %v3317_v35  ;;  %1344 = vmatmul.mubr.bf16.vlgmr.msra.gmra.mrb[12].mxu1 %v3317_v35 }
 0x18e   :  { %1183 = vmatpush1.bf16.msra.mxu0 %v921_v14  ;;  %1355 = vmatpush1.bf16.msra.mxu1 %v923_v15  ;;  %v977_v14 = vunpack.c.l.s8.bf16 %v641_v7  ;;  %v979_v15 = vunpack.c.l.s8.bf16 %v643_v8 }
 0x18f   :  { %1184 = vmatprep.subr.bf16.mxu0 %v929_v16  ;;  %1356 = vmatprep.subr.bf16.mxu1 %v931_v17  ;;  %v985_v16 = vunpack.c.h.s8.bf16 %v642_v2  ;;  %v987_v17 = vunpack.c.h.s8.bf16 %v644_v11  ;;  %v670_v2 = vld [vmem:[#allocation7 + $0x548] sm:$0xff]  ;;  %v672_v11 = vld [vmem:[#allocation7 + $0x558] sm:$0xff] }
 0x190   :  { %1214 = vmatprep.mubr.bf16.mxu0 %v3315_v33  ;;  %1386 = vmatprep.mubr.bf16.mxu1 %v3315_v33 }
 0x192   :  { %1185 = vmatpush1.bf16.msra.mxu0 %v928_v20  ;;  %1357 = vmatpush1.bf16.msra.mxu1 %v930_v21  ;;  %v984_v20 = vunpack.c.h.s8.bf16 %v641_v7  ;;  %v986_v21 = vunpack.c.h.s8.bf16 %v643_v8  ;;  %v669_v7 = vld [vmem:[#allocation7 + $0x540] sm:$0xff]  ;;  %v671_v8 = vld [vmem:[#allocation7 + $0x550] sm:$0xff] }
 0x193   :  { %1186 = vmatprep.subr.bf16.mxu0 %v936_v22  ;;  %1358 = vmatprep.subr.bf16.mxu1 %v938_v24  ;;  %v992_v22 = vunpack.c.l.s8.bf16 %v649_v18  ;;  %v994_v24 = vunpack.c.l.s8.bf16 %v651_v19 }
 0x196   :  { %1187 = vmatpush1.bf16.msra.mxu0 %v935_v27  ;;  %1359 = vmatpush1.bf16.msra.mxu1 %v937_v28  ;;  %v991_v27 = vunpack.c.l.s8.bf16 %v648_v25  ;;  %v993_v28 = vunpack.c.l.s8.bf16 %v650_v26 }
 0x197   :  { %1188 = vmatprep.subr.bf16.mxu0 %v943_v34  ;;  %1360 = vmatprep.subr.bf16.mxu1 %v945_v37  ;;  %v999_v34 = vunpack.c.h.s8.bf16 %v649_v18  ;;  %v1001_v37 = vunpack.c.h.s8.bf16 %v651_v19  ;;  %v677_v18 = vld [vmem:[#allocation7 + $0x580] sm:$0xff]  ;;  %v679_v19 = vld [vmem:[#allocation7 + $0x590] sm:$0xff] }
 0x19a   :  { %1189 = vmatpush1.bf16.msra.mxu0 %v942_v43  ;;  %1361 = vmatpush1.bf16.msra.mxu1 %v944_v44  ;;  %v998_v43 = vunpack.c.h.s8.bf16 %v648_v25  ;;  %v1000_v44 = vunpack.c.h.s8.bf16 %v650_v26  ;;  %v676_v25 = vld [vmem:[#allocation7 + $0x578] sm:$0xff]  ;;  %v678_v26 = vld [vmem:[#allocation7 + $0x588] sm:$0xff] }
 0x19b   :  { %1190 = vmatprep.subr.bf16.mxu0 %v950_v45  ;;  %1362 = vmatprep.subr.bf16.mxu1 %v952_v46  ;;  %v1006_v45 = vunpack.c.l.s8.bf16 %v656_v39  ;;  %v1008_v46 = vunpack.c.l.s8.bf16 %v658_v42 }
 0x19e   :  { %1191 = vmatpush1.bf16.msra.mxu0 %v949_v49  ;;  %1363 = vmatpush1.bf16.msra.mxu1 %v951_v50  ;;  %v1005_v49 = vunpack.c.l.s8.bf16 %v655_v47  ;;  %v1007_v50 = vunpack.c.l.s8.bf16 %v657_v48 }
 0x19f   :  { %1192 = vmatprep.subr.bf16.mxu0 %v957_v51  ;;  %1364 = vmatprep.subr.bf16.mxu1 %v959_v53  ;;  %v1013_v51 = vunpack.c.h.s8.bf16 %v656_v39  ;;  %v1015_v53 = vunpack.c.h.s8.bf16 %v658_v42  ;;  %v684_v39 = vld [vmem:[#allocation7 + $0x5b8] sm:$0xff]  ;;  %v686_v42 = vld [vmem:[#allocation7 + $0x5c8] sm:$0xff] }
 0x1a2   :  { %1193 = vmatpush1.bf16.msra.mxu0 %v956_v56  ;;  %1365 = vmatpush1.bf16.msra.mxu1 %v958_v57  ;;  %v1012_v56 = vunpack.c.h.s8.bf16 %v655_v47  ;;  %v1014_v57 = vunpack.c.h.s8.bf16 %v657_v48  ;;  %v683_v47 = vld [vmem:[#allocation7 + $0x5b0] sm:$0xff]  ;;  %v685_v48 = vld [vmem:[#allocation7 + $0x5c0] sm:$0xff] }
 0x1a3   :  { %1194 = vmatprep.subr.bf16.mxu0 %v964_v58  ;;  %1366 = vmatprep.subr.bf16.mxu1 %v966_v59  ;;  %v1020_v58 = vunpack.c.l.s8.bf16 %v663_v54  ;;  %v1022_v59 = vunpack.c.l.s8.bf16 %v665_v55 }
 0x1a6   :  { %1195 = vmatpush1.bf16.msra.mxu0 %v963_v62  ;;  %1367 = vmatpush1.bf16.msra.mxu1 %v965_v63  ;;  %v1019_v62 = vunpack.c.l.s8.bf16 %v662_v60  ;;  %v1021_v63 = vunpack.c.l.s8.bf16 %v664_v61 }
 0x1a7   :  { %1196 = vmatprep.subr.bf16.mxu0 %v971_v1  ;;  %1368 = vmatprep.subr.bf16.mxu1 %v973_v9  ;;  %v1027_v1 = vunpack.c.h.s8.bf16 %v663_v54  ;;  %v1029_v9 = vunpack.c.h.s8.bf16 %v665_v55  ;;  %v691_v54 = vld [vmem:[#allocation7 + $0x5f0] sm:$0xff]  ;;  %v693_v55 = vld [vmem:[#allocation7 + $0x600] sm:$0xff] }
 0x1aa   :  { %1197 = vmatpush1.bf16.msra.mxu0 %v970_v3  ;;  %1369 = vmatpush1.bf16.msra.mxu1 %v972_v4  ;;  %v1026_v3 = vunpack.c.h.s8.bf16 %v662_v60  ;;  %v1028_v4 = vunpack.c.h.s8.bf16 %v664_v61  ;;  %v690_v60 = vld [vmem:[#allocation7 + $0x5e8] sm:$0xff]  ;;  %v692_v61 = vld [vmem:[#allocation7 + $0x5f8] sm:$0xff] }
 0x1ab   :  { %1198 = vmatprep.subr.bf16.mxu0 %v978_v5  ;;  %1370 = vmatprep.subr.bf16.mxu1 %v980_v6  ;;  %v1034_v5 = vunpack.c.l.s8.bf16 %v670_v2  ;;  %v1036_v6 = vunpack.c.l.s8.bf16 %v672_v11 }
 0x1ae   :  { %1199 = vmatpush1.bf16.msra.mxu0 %v977_v14  ;;  %1371 = vmatpush1.bf16.msra.mxu1 %v979_v15  ;;  %v1033_v14 = vunpack.c.l.s8.bf16 %v669_v7  ;;  %v1035_v15 = vunpack.c.l.s8.bf16 %v671_v8 }
 0x1af   :  { %1200 = vmatprep.subr.bf16.mxu0 %v985_v16  ;;  %1372 = vmatprep.subr.bf16.mxu1 %v987_v17  ;;  %v1041_v16 = vunpack.c.h.s8.bf16 %v670_v2  ;;  %v1043_v17 = vunpack.c.h.s8.bf16 %v672_v11  ;;  %v506_v2 = vld [vmem:[#allocation7 + $0x28] sm:$0xff]  ;;  %v535_v11 = vld [vmem:[#allocation7 + $0x110] sm:$0xff] }
 0x1b2   :  { %1201 = vmatpush1.bf16.msra.mxu0 %v984_v20  ;;  %1373 = vmatpush1.bf16.msra.mxu1 %v986_v21  ;;  %v1040_v20 = vunpack.c.h.s8.bf16 %v669_v7  ;;  %v1042_v21 = vunpack.c.h.s8.bf16 %v671_v8  ;;  %v505_v7 = vld [vmem:[#allocation7 + $0x20] sm:$0xff]  ;;  %v507_v8 = vld [vmem:[#allocation7 + $0x30] sm:$0xff] }
 0x1b3   :  { %1202 = vmatprep.subr.bf16.mxu0 %v992_v22  ;;  %1374 = vmatprep.subr.bf16.mxu1 %v994_v24  ;;  %v1048_v22 = vunpack.c.l.s8.bf16 %v677_v18  ;;  %v1050_v24 = vunpack.c.l.s8.bf16 %v679_v19 }
 0x1b6   :  { %1203 = vmatpush1.bf16.msra.mxu0 %v991_v27  ;;  %1375 = vmatpush1.bf16.msra.mxu1 %v993_v28  ;;  %v1047_v27 = vunpack.c.l.s8.bf16 %v676_v25  ;;  %v1049_v28 = vunpack.c.l.s8.bf16 %v678_v26 }
 0x1b7   :  { %1204 = vmatprep.subr.bf16.mxu0 %v999_v34  ;;  %1376 = vmatprep.subr.bf16.mxu1 %v1001_v37  ;;  %v1055_v34 = vunpack.c.h.s8.bf16 %v677_v18  ;;  %v1057_v37 = vunpack.c.h.s8.bf16 %v679_v19  ;;  %v513_v18 = vld [vmem:[#allocation7 + $0x60] sm:$0xff]  ;;  %v542_v19 = vld [vmem:[#allocation7 + $0x148] sm:$0xff] }
 0x1ba   :  { %1205 = vmatpush1.bf16.msra.mxu0 %v998_v43  ;;  %1377 = vmatpush1.bf16.msra.mxu1 %v1000_v44  ;;  %v1054_v43 = vunpack.c.h.s8.bf16 %v676_v25  ;;  %v1056_v44 = vunpack.c.h.s8.bf16 %v678_v26  ;;  %v773_v25 = vunpack.c.l.s8.bf16 %v542_v19  ;;  %v514_v26 = vld [vmem:[#allocation7 + $0x68] sm:$0xff] }
 0x1bb   :  { %1206 = vmatprep.subr.bf16.mxu0 %v1006_v45  ;;  %1378 = vmatprep.subr.bf16.mxu1 %v1008_v46  ;;  %v1062_v45 = vunpack.c.l.s8.bf16 %v684_v39  ;;  %v1064_v46 = vunpack.c.l.s8.bf16 %v686_v42 }
 0x1be   :  { %1207 = vmatpush1.bf16.msra.mxu0 %v1005_v49  ;;  %1379 = vmatpush1.bf16.msra.mxu1 %v1007_v50  ;;  %v1061_v49 = vunpack.c.l.s8.bf16 %v683_v47  ;;  %v1063_v50 = vunpack.c.l.s8.bf16 %v685_v48 }
 0x1bf   :  { %1208 = vmatprep.subr.bf16.mxu0 %v1013_v51  ;;  %1380 = vmatprep.subr.bf16.mxu1 %v1015_v53  ;;  %v1069_v51 = vunpack.c.h.s8.bf16 %v684_v39  ;;  %v1071_v53 = vunpack.c.h.s8.bf16 %v686_v42  ;;  %v520_v39 = vld [vmem:[#allocation7 + $0x98] sm:$0xff]  ;;  %v549_v42 = vld [vmem:[#allocation7 + $0x180] sm:$0xff] }
 0x1c2   :  { %1209 = vmatpush1.bf16.msra.mxu0 %v1012_v56  ;;  %1381 = vmatpush1.bf16.msra.mxu1 %v1014_v57  ;;  %v1068_v56 = vunpack.c.h.s8.bf16 %v683_v47  ;;  %v1070_v57 = vunpack.c.h.s8.bf16 %v685_v48  ;;  %v521_v47 = vld [vmem:[#allocation7 + $0xa0] sm:$0xff] }
 0x1c3   :  { %1210 = vmatprep.subr.bf16.mxu0 %v1020_v58  ;;  %1382 = vmatprep.subr.bf16.mxu1 %v1022_v59  ;;  %v1076_v58 = vunpack.c.l.s8.bf16 %v691_v54  ;;  %v1078_v59 = vunpack.c.l.s8.bf16 %v693_v55 }
 0x1c6   :  { %1211 = vmatpush1.bf16.msra.mxu0 %v1019_v62  ;;  %1383 = vmatpush1.bf16.msra.mxu1 %v1021_v63  ;;  %v1075_v62 = vunpack.c.l.s8.bf16 %v690_v60  ;;  %v1077_v63 = vunpack.c.l.s8.bf16 %v692_v61 }
 0x1c7   :  { %1212 = vmatprep.subr.bf16.mxu0 %v1027_v1  ;;  %1384 = vmatprep.subr.bf16.mxu1 %v1029_v9  ;;  %v1083_v1 = vunpack.c.h.s8.bf16 %v691_v54  ;;  %v1085_v9 = vunpack.c.h.s8.bf16 %v693_v55  ;;  %v556_v54 = vld [vmem:[#allocation7 + $0x1b8] sm:$0xff] }
 0x1ca   :  { %1213 = vmatpush1.bf16.msra.mxu0 %v1026_v3  ;;  %1385 = vmatpush1.bf16.msra.mxu1 %v1028_v4  ;;  %v1082_v3 = vunpack.c.h.s8.bf16 %v690_v60  ;;  %v1084_v4 = vunpack.c.h.s8.bf16 %v692_v61  ;;  %v528_v60 = vld [vmem:[#allocation7 + $0xd8] sm:$0xff] }
 0x1cb   :  { %1225 = vmatprep.subr.bf16.mxu0 %v1034_v5  ;;  %1397 = vmatprep.subr.bf16.mxu1 %v1036_v6  ;;  %v702_v5 = vunpack.c.l.s8.bf16 %v506_v2  ;;  %v759_v6 = vunpack.c.l.s8.bf16 %v535_v11 }
 0x1cd   :  { %1215 = vmatmul.mubr.bf16.vlgmr.msra.gmra.mrb[4].mxu0 %v3313_v23  ;;  %1387 = vmatmul.mubr.bf16.vlgmr.msra.gmra.mrb[12].mxu1 %v3313_v23 }
 0x1ce   :  { %1226 = vmatpush1.bf16.msra.mxu0 %v1033_v14  ;;  %1398 = vmatpush1.bf16.msra.mxu1 %v1035_v15  ;;  %v701_v14 = vunpack.c.l.s8.bf16 %v505_v7  ;;  %v703_v15 = vunpack.c.l.s8.bf16 %v507_v8 }
 0x1cf   :  { %1227 = vmatprep.subr.bf16.mxu0 %v1041_v16  ;;  %1399 = vmatprep.subr.bf16.mxu1 %v1043_v17  ;;  %v709_v16 = vunpack.c.h.s8.bf16 %v506_v2  ;;  %v766_v17 = vunpack.c.h.s8.bf16 %v535_v11  ;;  %v591_v2 = vld [vmem:[#allocation7 + $0x2d0] sm:$0xff] }
 0x1d0   :  { %1257 = vmatprep.mubr.bf16.mxu0 %v3137_v0  ;;  %1429 = vmatprep.mubr.bf16.mxu1 %v3137_v0 }
 0x1d2   :  { %1228 = vmatpush1.bf16.msra.mxu0 %v1040_v20  ;;  %1400 = vmatpush1.bf16.msra.mxu1 %v1042_v21  ;;  %v708_v20 = vunpack.c.h.s8.bf16 %v505_v7  ;;  %v710_v21 = vunpack.c.h.s8.bf16 %v507_v8  ;;  %v563_v7 = vld [vmem:[#allocation7 + $0x1f0] sm:$0xff] }
 0x1d3   :  { %1229 = vmatprep.subr.bf16.mxu0 %v1048_v22  ;;  %1401 = vmatprep.subr.bf16.mxu1 %v1050_v24  ;;  %v716_v22 = vunpack.c.l.s8.bf16 %v513_v18  ;;  %v512_v24 = vld [vmem:[#allocation7 + $0x58] sm:$0xff] }
 0x1d6   :  { %1230 = vmatpush1.bf16.msra.mxu0 %v1047_v27  ;;  %1402 = vmatpush1.bf16.msra.mxu1 %v1049_v28  ;;  %v715_v27 = vunpack.c.l.s8.bf16 %v512_v24  ;;  %v717_v28 = vunpack.c.l.s8.bf16 %v514_v26 }
 0x1d7   :  { %1231 = vmatprep.subr.bf16.mxu0 %v1055_v34  ;;  %1403 = vmatprep.subr.bf16.mxu1 %v1057_v37  ;;  %v723_v34 = vunpack.c.h.s8.bf16 %v513_v18  ;;  %v780_v37 = vunpack.c.h.s8.bf16 %v542_v19  ;;  %v598_v18 = vld [vmem:[#allocation7 + $0x308] sm:$0xff] }
 0x1da   :  { %1232 = vmatpush1.bf16.msra.mxu0 %v1054_v43  ;;  %1404 = vmatpush1.bf16.msra.mxu1 %v1056_v44  ;;  %v722_v43 = vunpack.c.h.s8.bf16 %v512_v24  ;;  %v730_v44 = vunpack.c.l.s8.bf16 %v520_v39  ;;  %v885_v24 = vunpack.c.l.s8.bf16 %v598_v18 }
 0x1db   :  { %1233 = vmatprep.subr.bf16.mxu0 %v1062_v45  ;;  %1405 = vmatprep.subr.bf16.mxu1 %v1064_v46  ;;  %v519_v45 = vld [vmem:[#allocation7 + $0x90] sm:$0xff]  ;;  %v787_v46 = vunpack.c.l.s8.bf16 %v549_v42 }
 0x1dc   :  { %v729_v48 = vunpack.c.l.s8.bf16 %v519_v45  ;;  %v736_v55 = vunpack.c.h.s8.bf16 %v519_v45 }
 0x1de   :  { %1234 = vmatpush1.bf16.msra.mxu0 %v1061_v49  ;;  %1406 = vmatpush1.bf16.msra.mxu1 %v1063_v50  ;;  %v731_v49 = vunpack.c.l.s8.bf16 %v521_v47  ;;  %v737_v50 = vunpack.c.h.s8.bf16 %v520_v39  ;;  %v605_v39 = vld [vmem:[#allocation7 + $0x340] sm:$0xff] }
 0x1df   :  { %1235 = vmatprep.subr.bf16.mxu0 %v1069_v51  ;;  %1407 = vmatprep.subr.bf16.mxu1 %v1071_v53  ;;  %v794_v51 = vunpack.c.h.s8.bf16 %v549_v42  ;;  %v527_v53 = vld [vmem:[#allocation7 + $0xd0] sm:$0xff]  ;;  %v899_v45 = vunpack.c.l.s8.bf16 %v605_v39 }
 0x1e2   :  { %1236 = vmatpush1.bf16.msra.mxu0 %v1068_v56  ;;  %1408 = vmatpush1.bf16.msra.mxu1 %v1070_v57  ;;  %v738_v56 = vunpack.c.h.s8.bf16 %v521_v47  ;;  %v744_v57 = vunpack.c.l.s8.bf16 %v527_v53 }
 0x1e3   :  { %1237 = vmatprep.subr.bf16.mxu0 %v1076_v58  ;;  %1409 = vmatprep.subr.bf16.mxu1 %v1078_v59  ;;  %v526_v58 = vld [vmem:[#allocation7 + $0xc8] sm:$0xff]  ;;  %v801_v59 = vunpack.c.l.s8.bf16 %v556_v54 }
 0x1e4   :  { %v743_v61 = vunpack.c.l.s8.bf16 %v526_v58  ;;  %v750_v11 = vunpack.c.h.s8.bf16 %v526_v58 }
 0x1e6   :  { %1238 = vmatpush1.bf16.msra.mxu0 %v1075_v62  ;;  %1410 = vmatpush1.bf16.msra.mxu1 %v1077_v63  ;;  %v745_v62 = vunpack.c.l.s8.bf16 %v528_v60  ;;  %v751_v63 = vunpack.c.h.s8.bf16 %v527_v53  ;;  %v612_v53 = vld [vmem:[#allocation7 + $0x378] sm:$0xff] }
 0x1e7   :  { %1239 = vmatprep.subr.bf16.mxu0 %v1083_v1  ;;  %1411 = vmatprep.subr.bf16.mxu1 %v1085_v9  ;;  %v808_v1 = vunpack.c.h.s8.bf16 %v556_v54  ;;  %v534_v9 = vld [vmem:[#allocation7 + $0x108] sm:$0xff]  ;;  %v913_v58 = vunpack.c.l.s8.bf16 %v612_v53 }
 0x1ea   :  { %1240 = vmatpush1.bf16.msra.mxu0 %v1082_v3  ;;  %1412 = vmatpush1.bf16.msra.mxu1 %v1084_v4  ;;  %v752_v3 = vunpack.c.h.s8.bf16 %v528_v60  ;;  %v758_v4 = vunpack.c.l.s8.bf16 %v534_v9 }
 0x1eb   :  { %1440 = vmatprep.subr.bf16.mxu0 %v702_v5  ;;  %2633 = vmatprep.subr.bf16.mxu1 %v759_v6  ;;  %v533_v5 = vld [vmem:[#allocation7 + $0x100] sm:$0xff]  ;;  %v871_v6 = vunpack.c.l.s8.bf16 %v591_v2 }
 0x1ec   :  { %v757_v8 = vunpack.c.l.s8.bf16 %v533_v5  ;;  %v764_v19 = vunpack.c.h.s8.bf16 %v533_v5 }
 0x1ed   :  { %1258 = vmatmul.mubr.bf16.vlgmr.msra.gmra.mrb[4].mxu0 %v3328_v13  ;;  %1430 = vmatmul.mubr.bf16.vlgmr.msra.gmra.mrb[12].mxu1 %v3328_v13 }
 0x1ee   :  { %1441 = vmatpush1.bf16.msra.mxu0 %v701_v14  ;;  %1472 = vmatprep.mubr.bf16.mxu0 %v3293_v32  ;;  %v815_v14 = vunpack.c.l.s8.bf16 %v563_v7 }
 0x1ef   :  { %2634 = vmatpush3.bf16.msra.mxu1 %v703_v15  ;;  %1644 = vmatprep.mubr.bf16.mxu1 %v3293_v32  ;;  %v724_v32 = vunpack.c.h.s8.bf16 %v514_v26  ;;  %v765_v15 = vunpack.c.h.s8.bf16 %v534_v9  ;;  %v647_v9 = vld [vmem:[#allocation7 + $0x490] sm:$0xff] }
 0x1f0   :  { %1442 = vmatprep.subr.bf16.mxu0 %v709_v16  ;;  %2635 = vmatprep.subr.bf16.mxu1 %v766_v17  ;;  %v878_v16 = vunpack.c.h.s8.bf16 %v591_v2  ;;  %v541_v17 = vld [vmem:[#allocation7 + $0x140] sm:$0xff]  ;;  %v983_v5 = vunpack.c.l.s8.bf16 %v647_v9 }
 0x1f2   :  { %1443 = vmatpush1.bf16.msra.mxu0 %v708_v20  ;;  %v822_v20 = vunpack.c.h.s8.bf16 %v563_v7 }
 0x1f3   :  { %2636 = vmatpush3.bf16.msra.mxu1 %v710_v21  ;;  %1444 = vmatprep.subr.bf16.mxu0 %v716_v22  ;;  %v772_v21 = vunpack.c.l.s8.bf16 %v541_v17  ;;  %v540_v22 = vld [vmem:[#allocation7 + $0x138] sm:$0xff] }
 0x1f4   :  { %2637 = vmatprep.subr.bf16.mxu1 %v773_v25  ;;  %v570_v25 = vld [vmem:[#allocation7 + $0x228] sm:$0xff]  ;;  %v771_v26 = vunpack.c.l.s8.bf16 %v540_v22  ;;  %v778_v42 = vunpack.c.h.s8.bf16 %v540_v22 }
 0x1f6   :  { %1445 = vmatpush1.bf16.msra.mxu0 %v715_v27  ;;  %v829_v27 = vunpack.c.l.s8.bf16 %v570_v25 }
 0x1f7   :  { %2638 = vmatpush3.bf16.msra.mxu1 %v717_v28  ;;  %1446 = vmatprep.subr.bf16.mxu0 %v723_v34  ;;  %v779_v28 = vunpack.c.h.s8.bf16 %v541_v17  ;;  %v892_v34 = vunpack.c.h.s8.bf16 %v598_v18  ;;  %v654_v17 = vld [vmem:[#allocation7 + $0x4c8] sm:$0xff] }
 0x1f8   :  { %2639 = vmatprep.subr.bf16.mxu1 %v780_v37  ;;  %v548_v37 = vld [vmem:[#allocation7 + $0x178] sm:$0xff]  ;;  %v997_v22 = vunpack.c.l.s8.bf16 %v654_v17 }
 0x1fa   :  { %1447 = vmatpush1.bf16.msra.mxu0 %v722_v43  ;;  %v836_v43 = vunpack.c.h.s8.bf16 %v570_v25 }
 0x1fb   :  { %2640 = vmatpush3.bf16.msra.mxu1 %v724_v32  ;;  %1448 = vmatprep.subr.bf16.mxu0 %v730_v44  ;;  %v786_v32 = vunpack.c.l.s8.bf16 %v548_v37  ;;  %v547_v44 = vld [vmem:[#allocation7 + $0x170] sm:$0xff] }
 0x1fc   :  { %2641 = vmatprep.subr.bf16.mxu1 %v787_v46  ;;  %v577_v46 = vld [vmem:[#allocation7 + $0x260] sm:$0xff]  ;;  %v785_v47 = vunpack.c.l.s8.bf16 %v547_v44  ;;  %v792_v54 = vunpack.c.h.s8.bf16 %v547_v44 }
 0x1fe   :  { %1449 = vmatpush1.bf16.msra.mxu0 %v729_v48  ;;  %v843_v48 = vunpack.c.l.s8.bf16 %v577_v46 }
 0x1ff   :  { %2642 = vmatpush3.bf16.msra.mxu1 %v731_v49  ;;  %1450 = vmatprep.subr.bf16.mxu0 %v737_v50  ;;  %v793_v49 = vunpack.c.h.s8.bf16 %v548_v37  ;;  %v906_v50 = vunpack.c.h.s8.bf16 %v605_v39 }
 0x200   :  { %2643 = vmatprep.subr.bf16.mxu1 %v794_v51  ;;  %v555_v51 = vld [vmem:[#allocation7 + $0x1b0] sm:$0xff] }
 0x202   :  { %1451 = vmatpush1.bf16.msra.mxu0 %v736_v55  ;;  %v850_v55 = vunpack.c.h.s8.bf16 %v577_v46 }
 0x203   :  { %2644 = vmatpush3.bf16.msra.mxu1 %v738_v56  ;;  %1452 = vmatprep.subr.bf16.mxu0 %v744_v57  ;;  %v800_v56 = vunpack.c.l.s8.bf16 %v555_v51  ;;  %v554_v57 = vld [vmem:[#allocation7 + $0x1a8] sm:$0xff] }
 0x204   :  { %2645 = vmatprep.subr.bf16.mxu1 %v801_v59  ;;  %v584_v59 = vld [vmem:[#allocation7 + $0x298] sm:$0xff]  ;;  %v799_v60 = vunpack.c.l.s8.bf16 %v554_v57  ;;  %v806_v2 = vunpack.c.h.s8.bf16 %v554_v57 }
 0x206   :  { %1453 = vmatpush1.bf16.msra.mxu0 %v743_v61  ;;  %v857_v61 = vunpack.c.l.s8.bf16 %v584_v59 }
 0x207   :  { %2646 = vmatpush3.bf16.msra.mxu1 %v745_v62  ;;  %1454 = vmatprep.subr.bf16.mxu0 %v751_v63  ;;  %v807_v62 = vunpack.c.h.s8.bf16 %v555_v51  ;;  %v920_v63 = vunpack.c.h.s8.bf16 %v612_v53 }
 0x208   :  { %2647 = vmatprep.subr.bf16.mxu1 %v808_v1  ;;  %v562_v1 = vld [vmem:[#allocation7 + $0x1e8] sm:$0xff] }
 0x20a   :  { %1455 = vmatpush1.bf16.msra.mxu0 %v750_v11  ;;  %v864_v11 = vunpack.c.h.s8.bf16 %v584_v59 }
 0x20b   :  { %2648 = vmatpush3.bf16.msra.mxu1 %v752_v3  ;;  %1456 = vmatprep.subr.bf16.mxu0 %v758_v4  ;;  %v814_v3 = vunpack.c.l.s8.bf16 %v562_v1  ;;  %v561_v4 = vld [vmem:[#allocation7 + $0x1e0] sm:$0xff] }
 0x20c   :  { %2655 = vmatprep.subr.bf16.mxu1 %v871_v6  ;;  %v619_v6 = vld [vmem:[#allocation7 + $0x3b0] sm:$0xff]  ;;  %v813_v7 = vunpack.c.l.s8.bf16 %v561_v4  ;;  %v820_v18 = vunpack.c.h.s8.bf16 %v561_v4 }
 0x20e   :  { %1645 = vmatmul.mubr.bf16.vlgmr.msra.gmra.mrb[16].mxu1 %v3288_v30  ;;  %1457 = vmatpush1.bf16.msra.mxu0 %v757_v8  ;;  %v927_v8 = vunpack.c.l.s8.bf16 %v619_v6 }
 0x20f   :  { %2656 = vmatpush3.bf16.msra.mxu1 %v815_v14  ;;  %1685 = vmatprep.mubr.bf16.mxu1 %v3319_v40  ;;  %v821_v14 = vunpack.c.h.s8.bf16 %v562_v1 }
 0x210   :  { %1458 = vmatprep.subr.bf16.mxu0 %v765_v15  ;;  %2657 = vmatprep.subr.bf16.mxu1 %v878_v16  ;;  %v569_v15 = vld [vmem:[#allocation7 + $0x220] sm:$0xff]  ;;  %v990_v16 = vunpack.c.h.s8.bf16 %v647_v9 }
 0x211   :  { %v589_v9 = vld [vmem:[#allocation7 + $0x2c0] sm:$0xff] }
 0x212   :  { %1459 = vmatpush1.bf16.msra.mxu0 %v764_v19  ;;  %v934_v19 = vunpack.c.h.s8.bf16 %v619_v6  ;;  %v876_v6 = vunpack.c.h.s8.bf16 %v589_v9 }
 0x213   :  { %2658 = vmatpush3.bf16.msra.mxu1 %v822_v20  ;;  %1460 = vmatprep.subr.bf16.mxu0 %v772_v21  ;;  %v828_v20 = vunpack.c.l.s8.bf16 %v569_v15  ;;  %v568_v21 = vld [vmem:[#allocation7 + $0x218] sm:$0xff] }
 0x214   :  { %2659 = vmatprep.subr.bf16.mxu1 %v885_v24  ;;  %v626_v24 = vld [vmem:[#allocation7 + $0x3e8] sm:$0xff] }
 0x215   :  { %v941_v25 = vunpack.c.l.s8.bf16 %v626_v24  ;;  %v948_v37 = vunpack.c.h.s8.bf16 %v626_v24  ;;  %v603_v24 = vld [vmem:[#allocation7 + $0x330] sm:$0xff] }
 0x216   :  { %1461 = vmatpush1.bf16.msra.mxu0 %v771_v26  ;;  %v835_v26 = vunpack.c.h.s8.bf16 %v569_v15  ;;  %v682_v15 = vld [vmem:[#allocation7 + $0x5a8] sm:$0xff] }
 0x217   :  { %2660 = vmatpush3.bf16.msra.mxu1 %v829_v27  ;;  %1462 = vmatprep.subr.bf16.mxu0 %v779_v28  ;;  %v1004_v27 = vunpack.c.h.s8.bf16 %v654_v17  ;;  %v576_v28 = vld [vmem:[#allocation7 + $0x258] sm:$0xff]  ;;  %v1053_v17 = vunpack.c.l.s8.bf16 %v682_v15 }
 0x218   :  { %2661 = vmatprep.subr.bf16.mxu1 %v892_v34  ;;  %v834_v34 = vunpack.c.h.s8.bf16 %v568_v21  ;;  %v842_v39 = vunpack.c.l.s8.bf16 %v576_v28  ;;  %v849_v46 = vunpack.c.h.s8.bf16 %v576_v28  ;;  %v611_v28 = vld [vmem:[#allocation7 + $0x370] sm:$0xff] }
 0x21a   :  { %1463 = vmatpush1.bf16.msra.mxu0 %v778_v42  ;;  %v575_v42 = vld [vmem:[#allocation7 + $0x250] sm:$0xff] }
 0x21b   :  { %2662 = vmatpush3.bf16.msra.mxu1 %v836_v43  ;;  %1464 = vmatprep.subr.bf16.mxu0 %v786_v32  ;;  %v633_v32 = vld [vmem:[#allocation7 + $0x420] sm:$0xff]  ;;  %v841_v44 = vunpack.c.l.s8.bf16 %v575_v42 }
 0x21c   :  { %2663 = vmatprep.subr.bf16.mxu1 %v899_v45  ;;  %v955_v45 = vunpack.c.l.s8.bf16 %v633_v32  ;;  %v962_v51 = vunpack.c.h.s8.bf16 %v633_v32 }
 0x21e   :  { %1465 = vmatpush1.bf16.msra.mxu0 %v785_v47 }
 0x21f   :  { %2664 = vmatpush3.bf16.msra.mxu1 %v843_v48  ;;  %1466 = vmatprep.subr.bf16.mxu0 %v793_v49  ;;  %v583_v48 = vld [vmem:[#allocation7 + $0x290] sm:$0xff]  ;;  %v668_v49 = vld [vmem:[#allocation7 + $0x538] sm:$0xff] }
 0x220   :  { %2665 = vmatprep.subr.bf16.mxu1 %v906_v50  ;;  %v848_v50 = vunpack.c.h.s8.bf16 %v575_v42  ;;  %v856_v53 = vunpack.c.l.s8.bf16 %v583_v48  ;;  %v863_v59 = vunpack.c.h.s8.bf16 %v583_v48  ;;  %v696_v42 = vld [vmem:[#allocation7 + $0x618] sm:$0xff] }
 0x221   :  { %v1081_v32 = vunpack.c.l.s8.bf16 %v696_v42 }
 0x222   :  { %1467 = vmatpush1.bf16.msra.mxu0 %v792_v54  ;;  %v582_v54 = vld [vmem:[#allocation7 + $0x288] sm:$0xff] }
 0x223   :  { %2666 = vmatpush3.bf16.msra.mxu1 %v850_v55  ;;  %1468 = vmatprep.subr.bf16.mxu0 %v800_v56  ;;  %v1025_v55 = vunpack.c.l.s8.bf16 %v668_v49  ;;  %v640_v56 = vld [vmem:[#allocation7 + $0x458] sm:$0xff]  ;;  %v855_v57 = vunpack.c.l.s8.bf16 %v582_v54 }
 0x224   :  { %2667 = vmatprep.subr.bf16.mxu1 %v913_v58  ;;  %v969_v58 = vunpack.c.l.s8.bf16 %v640_v56 }
 0x226   :  { %1469 = vmatpush1.bf16.msra.mxu0 %v799_v60  ;;  %v1032_v60 = vunpack.c.h.s8.bf16 %v668_v49  ;;  %v617_v49 = vld [vmem:[#allocation7 + $0x3a0] sm:$0xff] }
 0x227   :  { %2668 = vmatpush3.bf16.msra.mxu1 %v857_v61  ;;  %1470 = vmatprep.subr.bf16.mxu0 %v807_v62  ;;  %v590_v61 = vld [vmem:[#allocation7 + $0x2c8] sm:$0xff]  ;;  %v862_v62 = vunpack.c.h.s8.bf16 %v582_v54  ;;  %v625_v54 = vld [vmem:[#allocation7 + $0x3e0] sm:$0xff] }
 0x228   :  { %2669 = vmatprep.subr.bf16.mxu1 %v920_v63  ;;  %v976_v63 = vunpack.c.h.s8.bf16 %v640_v56  ;;  %v870_v1 = vunpack.c.l.s8.bf16 %v590_v61  ;;  %v877_v4 = vunpack.c.h.s8.bf16 %v590_v61  ;;  %v2930_v56 = vld [vmem:[#allocation10 + $0x48] sm:$0xff]   ;;  %v2932_v61 = vld [vmem:[#allocation10 + $0x50] sm:$0xff]  }
 0x22a   :  { %1471 = vmatpush1.bf16.msra.mxu0 %v806_v2  ;;  %v675_v2 = vld [vmem:[#allocation7 + $0x570] sm:$0xff] }
 0x22b   :  { %2670 = vmatpush3.bf16.msra.mxu1 %v864_v11  ;;  %1483 = vmatprep.subr.bf16.mxu0 %v814_v3  ;;  %v869_v11 = vunpack.c.l.s8.bf16 %v589_v9  ;;  %v1039_v3 = vunpack.c.l.s8.bf16 %v675_v2  ;;  %v2934_v9 = vld [vmem:[#allocation10 + $0x58] sm:$0xff]  }
 0x22c   :  { %2677 = vmatprep.subr.bf16.mxu1 %v983_v5  ;;  %v597_v5 = vld [vmem:[#allocation7 + $0x300] sm:$0xff] }
 0x22d   :  { %1473 = vmatmul.mubr.bf16.vlgmr.msra.gmra.mrb[8].mxu0 %v3288_v30  ;;  %v827_v30 = vunpack.c.l.s8.bf16 %v568_v21  ;;  %v1060_v21 = vunpack.c.h.s8.bf16 %v682_v15 }
 0x22e   :  { %1686 = vmatmul.mubr.bf16.vlgmr.msra.gmra.mrb[20].mxu1 %v3317_v35  ;;  %1484 = vmatpush1.bf16.msra.mxu0 %v813_v7  ;;  %v1046_v7 = vunpack.c.h.s8.bf16 %v675_v2 }
 0x22f   :  { %1515 = vmatprep.mubr.bf16.mxu0 %v3319_v40  ;;  %2678 = vmatpush3.bf16.msra.mxu1 %v927_v8  ;;  %v661_v40 = vld [vmem:[#allocation7 + $0x500] sm:$0xff]  ;;  %v884_v8 = vunpack.c.l.s8.bf16 %v597_v5 }
 0x230   :  { %1726 = vmatprep.mubr.bf16.mxu1 %v3315_v33  ;;  %1485 = vmatprep.subr.bf16.mxu0 %v821_v14  ;;  %v1011_v43 = vunpack.c.l.s8.bf16 %v661_v40  ;;  %v1018_v47 = vunpack.c.h.s8.bf16 %v661_v40  ;;  %v596_v14 = vld [vmem:[#allocation7 + $0x2f8] sm:$0xff]  ;;  %v904_v40 = vunpack.c.h.s8.bf16 %v603_v24 }
 0x231   :  { %2679 = vmatprep.subr.bf16.mxu1 %v990_v16  ;;  %v883_v16 = vunpack.c.l.s8.bf16 %v596_v14 }
 0x232   :  { %1486 = vmatpush1.bf16.msra.mxu0 %v820_v18  ;;  %v891_v18 = vunpack.c.h.s8.bf16 %v597_v5 }
 0x233   :  { %2680 = vmatpush3.bf16.msra.mxu1 %v934_v19  ;;  %1487 = vmatprep.subr.bf16.mxu0 %v828_v20  ;;  %v604_v19 = vld [vmem:[#allocation7 + $0x338] sm:$0xff]  ;;  %v890_v20 = vunpack.c.h.s8.bf16 %v596_v14  ;;  %v2938_v14 = vld [vmem:[#allocation10 + $0x68] sm:$0xff]  }
 0x234   :  { %2681 = vmatprep.subr.bf16.mxu1 %v997_v22  ;;  %v898_v22 = vunpack.c.l.s8.bf16 %v604_v19 }
 0x236   :  { %1488 = vmatpush1.bf16.msra.mxu0 %v827_v30  ;;  %v689_v30 = vld [vmem:[#allocation7 + $0x5e0] sm:$0xff] }
 0x237   :  { %2682 = vmatpush3.bf16.msra.mxu1 %v941_v25  ;;  %1489 = vmatprep.subr.bf16.mxu0 %v835_v26  ;;  %v897_v25 = vunpack.c.l.s8.bf16 %v603_v24  ;;  %v1067_v26 = vunpack.c.l.s8.bf16 %v689_v30  ;;  %v2941_v24 = vld [vmem:[#allocation10 + $0x30] sm:$0xff]  }
 0x238   :  { %2683 = vmatprep.subr.bf16.mxu1 %v1004_v27  ;;  %v905_v27 = vunpack.c.h.s8.bf16 %v604_v19  ;;  %v2940_v19 = vld [vmem:[#allocation10 + $0x70] sm:$0xff]  }
 0x23a   :  { %1490 = vmatpush1.bf16.msra.mxu0 %v834_v34  ;;  %v1074_v34 = vunpack.c.h.s8.bf16 %v689_v30  ;;  %v2942_v30 = vld [vmem:[#allocation10 + $0x78] sm:$0xff]  }
 0x23b   :  { %2684 = vmatpush3.bf16.msra.mxu1 %v948_v37  ;;  %1491 = vmatprep.subr.bf16.mxu0 %v842_v39  ;;  %v912_v37 = vunpack.c.l.s8.bf16 %v611_v28  ;;  %v610_v39 = vld [vmem:[#allocation7 + $0x368] sm:$0xff] }
 0x23c   :  { %2685 = vmatprep.subr.bf16.mxu1 %v1011_v43  ;;  %v911_v43 = vunpack.c.l.s8.bf16 %v610_v39 }
 0x23e   :  { %1492 = vmatpush1.bf16.msra.mxu0 %v841_v44  ;;  %v919_v44 = vunpack.c.h.s8.bf16 %v611_v28  ;;  %v2943_v28 = vld [vmem:[#allocation10 + $0x38] sm:$0xff]  }
 0x23f   :  { %2686 = vmatpush3.bf16.msra.mxu1 %v955_v45  ;;  %1493 = vmatprep.subr.bf16.mxu0 %v849_v46  ;;  %v618_v45 = vld [vmem:[#allocation7 + $0x3a8] sm:$0xff]  ;;  %v918_v46 = vunpack.c.h.s8.bf16 %v610_v39  ;;  %v653_v39 = vld [vmem:[#allocation7 + $0x4c0] sm:$0xff] }
 0x240   :  { %2687 = vmatprep.subr.bf16.mxu1 %v1018_v47  ;;  %v1088_v47 = vunpack.c.h.s8.bf16 %v696_v42  ;;  %v926_v48 = vunpack.c.l.s8.bf16 %v618_v45 }
 0x242   :  { %1494 = vmatpush1.bf16.msra.mxu0 %v848_v50  ;;  %v2928_v50 = vld [vmem:[#allocation10 + $0x40] sm:$0xff]  }
 0x243   :  { %2688 = vmatpush3.bf16.msra.mxu1 %v962_v51  ;;  %1495 = vmatprep.subr.bf16.mxu0 %v856_v53  ;;  %v925_v51 = vunpack.c.l.s8.bf16 %v617_v49  ;;  %v933_v53 = vunpack.c.h.s8.bf16 %v618_v45  ;;  %v1003_v45 = vunpack.c.h.s8.bf16 %v653_v39 }
 0x244   :  { %2689 = vmatprep.subr.bf16.mxu1 %v1025_v55  ;;  %v2929_v55 = vld [vmem:[#allocation10] sm:$0xff]  }
 0x246   :  { %1496 = vmatpush1.bf16.msra.mxu0 %v855_v57  ;;  %v932_v57 = vunpack.c.h.s8.bf16 %v617_v49  ;;  %v659_v49 = vld [vmem:[#allocation7 + $0x4f0] sm:$0xff] }
 0x247   :  { %2690 = vmatpush3.bf16.msra.mxu1 %v969_v58  ;;  %1497 = vmatprep.subr.bf16.mxu0 %v863_v59  ;;  %v940_v58 = vunpack.c.l.s8.bf16 %v625_v54  ;;  %v624_v59 = vld [vmem:[#allocation7 + $0x3d8] sm:$0xff] }
 0x248   :  { %2691 = vmatprep.subr.bf16.mxu1 %v1032_v60  ;;  %v2931_v60 = vld [vmem:[#allocation10 + $0x8] sm:$0xff]   ;;  %v946_v2 = vunpack.c.h.s8.bf16 %v624_v59 }
 0x24a   :  { %1498 = vmatpush1.bf16.msra.mxu0 %v862_v62  ;;  %v939_v62 = vunpack.c.l.s8.bf16 %v624_v59  ;;  %v674_v59 = vld [vmem:[#allocation7 + $0x568] sm:$0xff] }
 0x24b   :  { %2692 = vmatpush3.bf16.msra.mxu1 %v976_v63  ;;  %1499 = vmatprep.subr.bf16.mxu0 %v870_v1  ;;  %v947_v63 = vunpack.c.h.s8.bf16 %v625_v54  ;;  %v632_v1 = vld [vmem:[#allocation7 + $0x418] sm:$0xff]  ;;  %v1016_v54 = vunpack.c.h.s8.bf16 %v659_v49 }
 0x24c   :  { %2795 = vmatprep.subr.bf16.mxu1 %v3138_v36 }
 0x24e   :  { %1727 = vmatmul.mubr.bf16.vlgmr.msra.gmra.mrb[24].mxu1 %v3313_v23  ;;  %1500 = vmatpush1.bf16.msra.mxu0 %v869_v11  ;;  %v631_v11 = vld [vmem:[#allocation7 + $0x410] sm:$0xff] }
 0x24f   :  { %2796 = vmatpush3.bf16.msra.mxu1 %v1039_v3  ;;  %1501 = vmatprep.subr.bf16.mxu0 %v877_v4  ;;  %v2935_v3 = vld [vmem:[#allocation10 + $0x18] sm:$0xff]   ;;  %v2936_v4 = vld [vmem:[#allocation10 + $0x60] sm:$0xff]   ;;  %v953_v5 = vunpack.c.l.s8.bf16 %v631_v11  ;;  %v960_v15 = vunpack.c.h.s8.bf16 %v631_v11 }
 0x250   :  { %2797 = vmatprep.subr.bf16.mxu1 %v3138_v36  ;;  %2811 = vmatprep.mubr.msk.bf16.mxu1 %vm3139_vm1, %v3138_v36 }
 0x252   :  { %1502 = vmatpush1.bf16.msra.mxu0 %v876_v6  ;;  %v961_v6 = vunpack.c.h.s8.bf16 %v632_v1 }
 0x253   :  { %2798 = vmatpush3.bf16.msra.mxu1 %v1046_v7  ;;  %1503 = vmatprep.subr.bf16.mxu0 %v884_v8  ;;  %v639_v7 = vld [vmem:[#allocation7 + $0x450] sm:$0xff]  ;;  %v2937_v8 = vld [vmem:[#allocation10 + $0x20] sm:$0xff]  }
 0x254   :  { %2799 = vmatprep.subr.bf16.mxu1 %v3138_v36 }
 0x256   :  { %1504 = vmatpush1.bf16.msra.mxu0 %v883_v16  ;;  %v968_v16 = vunpack.c.l.s8.bf16 %v639_v7 }
 0x257   :  { %2800 = vmatpush3.bf16.msra.mxu1 %v1053_v17  ;;  %1505 = vmatprep.subr.bf16.mxu0 %v891_v18  ;;  %v638_v17 = vld [vmem:[#allocation7 + $0x448] sm:$0xff]  ;;  %v2939_v18 = vld [vmem:[#allocation10 + $0x28] sm:$0xff]  }
 0x258   :  { %2801 = vmatprep.subr.bf16.mxu1 %v3138_v36 }
 0x25a   :  { %1506 = vmatpush1.bf16.msra.mxu0 %v890_v20  ;;  %v967_v20 = vunpack.c.l.s8.bf16 %v638_v17 }
 0x25b   :  { %2802 = vmatpush3.bf16.msra.mxu1 %v1060_v21  ;;  %1507 = vmatprep.subr.bf16.mxu0 %v898_v22  ;;  %v975_v21 = vunpack.c.h.s8.bf16 %v639_v7  ;;  %v646_v22 = vld [vmem:[#allocation7 + $0x488] sm:$0xff]  ;;  %v687_v7 = vld [vmem:[#allocation7 + $0x5d0] sm:$0xff] }
 0x25c   :  { %2803 = vmatprep.subr.bf16.mxu1 %v3138_v36 }
 0x25e   :  { %1508 = vmatpush1.bf16.msra.mxu0 %v897_v25  ;;  %v974_v25 = vunpack.c.h.s8.bf16 %v638_v17 }
 0x25f   :  { %2804 = vmatpush3.bf16.msra.mxu1 %v1067_v26  ;;  %1509 = vmatprep.subr.bf16.mxu0 %v905_v27  ;;  %v982_v26 = vunpack.c.l.s8.bf16 %v646_v22  ;;  %v645_v27 = vld [vmem:[#allocation7 + $0x480] sm:$0xff] }
 0x260   :  { %2805 = vmatprep.subr.bf16.mxu1 %v3138_v36  ;;  %v988_v42 = vunpack.c.h.s8.bf16 %v645_v27 }
 0x262   :  { %1510 = vmatpush1.bf16.msra.mxu0 %v904_v40  ;;  %v2944_v40 = vld [vmem:[#allocation10 + $0xc0] sm:$0xff]  }
 0x263   :  { %2806 = vmatpush3.bf16.msra.mxu1 %v1074_v34  ;;  %1511 = vmatprep.subr.bf16.mxu0 %v912_v37  ;;  %v981_v34 = vunpack.c.l.s8.bf16 %v645_v27  ;;  %v989_v37 = vunpack.c.h.s8.bf16 %v646_v22 }
 0x264   :  { %2807 = vmatprep.subr.bf16.mxu1 %v3138_v36 }
 0x266   :  { %1512 = vmatpush1.bf16.msra.mxu0 %v911_v43  ;;  %v996_v43 = vunpack.c.l.s8.bf16 %v653_v39 }
 0x267   :  { %2808 = vmatpush3.bf16.msra.mxu1 %v1081_v32  ;;  %1513 = vmatprep.subr.bf16.mxu0 %v919_v44  ;;  %v652_v32 = vld [vmem:[#allocation7 + $0x4b8] sm:$0xff] }
 0x268   :  { %2809 = vmatprep.subr.bf16.mxu1 %v3138_v36  ;;  %v995_v44 = vunpack.c.l.s8.bf16 %v652_v32 }
 0x26a   :  { %1514 = vmatpush1.bf16.msra.mxu0 %v918_v46  ;;  %v660_v46 = vld [vmem:[#allocation7 + $0x4f8] sm:$0xff] }
 0x26b   :  { %2810 = vmatpush3.bf16.msra.mxu1 %v1088_v47  ;;  %1526 = vmatprep.subr.bf16.mxu0 %v926_v48  ;;  %v1002_v47 = vunpack.c.h.s8.bf16 %v652_v32  ;;  %v1010_v48 = vunpack.c.l.s8.bf16 %v660_v46 }
 0x26c   :  { %2708 = vmatprep.subr.bf16.mxu1 %v2928_v50  ;;  %v1009_v50 = vunpack.c.l.s8.bf16 %v659_v49 }
 0x26d   :  { %1516 = vmatmul.mubr.bf16.vlgmr.msra.gmra.mrb[8].mxu0 %v3317_v35  ;;  %v2933_v35 = vld [vmem:[#allocation10 + $0x10] sm:$0xff]  }
 0x26e   :  { %2812 = vmatmul.mubr.bf16.vlgmr.msra.gmra.mrb[28].mxu1 %v3328_v13  ;;  %1527 = vmatpush1.bf16.msra.mxu0 %v925_v51  ;;  %v1017_v51 = vunpack.c.h.s8.bf16 %v660_v46 }
 0x26f   :  { %1558 = vmatprep.mubr.bf16.mxu0 %v3315_v33  ;;  %1528 = vmatprep.subr.bf16.mxu0 %v933_v53  ;;  %v954_v33 = vunpack.c.l.s8.bf16 %v632_v1  ;;  %v667_v53 = vld [vmem:[#allocation7 + $0x530] sm:$0xff]  ;;  %v1045_v1 = vunpack.c.h.s8.bf16 %v674_v59 }
 0x270   :  { %2709 = vmatpush3.bf16.msra.mxu1 %v2929_v55  ;;  %v1024_v55 = vunpack.c.l.s8.bf16 %v667_v53 }
 0x271   :  { %2710 = vmatprep.subr.bf16.mxu1 %v2930_v56  ;;  %v666_v56 = vld [vmem:[#allocation7 + $0x528] sm:$0xff] }
 0x272   :  { %1529 = vmatpush1.bf16.msra.mxu0 %v932_v57  ;;  %v1023_v57 = vunpack.c.l.s8.bf16 %v666_v56 }
 0x273   :  { %1530 = vmatprep.subr.bf16.mxu0 %v940_v58  ;;  %v1031_v58 = vunpack.c.h.s8.bf16 %v667_v53 }
 0x274   :  { %2711 = vmatpush3.bf16.msra.mxu1 %v2931_v60  ;;  %v1030_v60 = vunpack.c.h.s8.bf16 %v666_v56 }
 0x275   :  { %2712 = vmatprep.subr.bf16.mxu1 %v2932_v61  ;;  %v1038_v61 = vunpack.c.l.s8.bf16 %v674_v59 }
 0x276   :  { %1531 = vmatpush1.bf16.msra.mxu0 %v939_v62  ;;  %v673_v62 = vld [vmem:[#allocation7 + $0x560] sm:$0xff] }
 0x277   :  { %1532 = vmatprep.subr.bf16.mxu0 %v947_v63  ;;  %v1037_v63 = vunpack.c.l.s8.bf16 %v673_v62 }
 0x278   :  { %2713 = vmatpush3.bf16.msra.mxu1 %v2933_v35  ;;  %v681_v35 = vld [vmem:[#allocation7 + $0x5a0] sm:$0xff] }
 0x279   :  { %2714 = vmatprep.subr.bf16.mxu1 %v2934_v9  ;;  %v1044_v9 = vunpack.c.h.s8.bf16 %v673_v62 }
 0x27a   :  { %1533 = vmatpush1.bf16.msra.mxu0 %v946_v2  ;;  %v1052_v2 = vunpack.c.l.s8.bf16 %v681_v35 }
 0x27b   :  { %1534 = vmatprep.subr.bf16.mxu0 %v954_v33  ;;  %v680_v33 = vld [vmem:[#allocation7 + $0x598] sm:$0xff] }
 0x27c   :  { %2715 = vmatpush3.bf16.msra.mxu1 %v2935_v3  ;;  %v1051_v11 = vunpack.c.l.s8.bf16 %v680_v33  ;;  %v1059_v3 = vunpack.c.h.s8.bf16 %v681_v35 }
 0x27d   :  { %2716 = vmatprep.subr.bf16.mxu1 %v2936_v4  ;;  %v688_v4 = vld [vmem:[#allocation7 + $0x5d8] sm:$0xff] }
 0x27e   :  { %1535 = vmatpush1.bf16.msra.mxu0 %v953_v5  ;;  %v1058_v5 = vunpack.c.h.s8.bf16 %v680_v33 }
 0x27f   :  { %1536 = vmatprep.subr.bf16.mxu0 %v961_v6  ;;  %v1066_v6 = vunpack.c.l.s8.bf16 %v688_v4 }
 0x280   :  { %2717 = vmatpush3.bf16.msra.mxu1 %v2937_v8  ;;  %v1065_v8 = vunpack.c.l.s8.bf16 %v687_v7 }
 0x281   :  { %2718 = vmatprep.subr.bf16.mxu1 %v2938_v14  ;;  %v3369_v14 = vld [vmem:[#allocation8] sm:$0xff] }
 0x282   :  { %1537 = vmatpush1.bf16.msra.mxu0 %v960_v15  ;;  %v695_v15 = vld [vmem:[#allocation7 + $0x610] sm:$0xff]  ;;  %v1840_v22 = vrot.slane %v3369_v14, %v3296_v38  ;;  %v1836_v27 = vrot.slane %v3369_v14, %v3279_v12 }
 0x283   :  { %1538 = vmatprep.subr.bf16.mxu0 %v968_v16 }
 0x284   :  { %2719 = vmatpush3.bf16.msra.mxu1 %v2939_v18 }
 0x285   :  { %2720 = vmatprep.subr.bf16.mxu1 %v2940_v19 }
 0x286   :  { %1539 = vmatpush1.bf16.msra.mxu0 %v967_v20  ;;  %v1072_v20 = vunpack.c.h.s8.bf16 %v687_v7  ;;  %v2947_v7 = vld [vmem:[#allocation10 + $0x88] sm:$0xff]  }
 0x287   :  { %1540 = vmatprep.subr.bf16.mxu0 %v975_v21  ;;  %v1832_v21 = vrot.slane %v3369_v14, %v3271_v10 }
 0x288   :  { %2721 = vmatpush3.bf16.msra.mxu1 %v2941_v24  ;;  %v1080_v24 = vunpack.c.l.s8.bf16 %v695_v15 }
 0x289   :  { %2722 = vmatprep.subr.bf16.mxu1 %v2942_v30  ;;  %v694_v30 = vld [vmem:[#allocation7 + $0x608] sm:$0xff] }
 0x28a   :  { %1541 = vmatpush1.bf16.msra.mxu0 %v974_v25 }
 0x28b   :  { %1542 = vmatprep.subr.bf16.mxu0 %v982_v26 }
 0x28c   :  { %2723 = vmatpush3.bf16.msra.mxu1 %v2943_v28  ;;  %v1844_v28 = vrot.slane %v3369_v14, %v3301_v41 }
 0x28d   :  { %2730 = vmatprep.subr.bf16.mxu1 %v2944_v40 }
 0x28e   :  { %1543 = vmatpush1.bf16.msra.mxu0 %v981_v34 }
 0x28f   :  { %1544 = vmatprep.subr.bf16.mxu0 %v989_v37 }
 0x292   :  { %1545 = vmatpush1.bf16.msra.mxu0 %v988_v42 }
 0x293   :  { %1546 = vmatprep.subr.bf16.mxu0 %v996_v43 }
 0x296   :  { %1547 = vmatpush1.bf16.msra.mxu0 %v995_v44  ;;  %v1087_v44 = vunpack.c.h.s8.bf16 %v695_v15  ;;  %v2949_v15 = vld [vmem:[#allocation10 + $0x90] sm:$0xff]  }
 0x297   :  { %1548 = vmatprep.subr.bf16.mxu0 %v1003_v45 }
 0x29a   :  { %1549 = vmatpush1.bf16.msra.mxu0 %v1002_v47 }
 0x29b   :  { %1550 = vmatprep.subr.bf16.mxu0 %v1010_v48 }
 0x29e   :  { %1551 = vmatpush1.bf16.msra.mxu0 %v1009_v50 }
 0x29f   :  { %1552 = vmatprep.subr.bf16.mxu0 %v1017_v51 }
 0x2a2   :  { %1553 = vmatpush1.bf16.msra.mxu0 %v1016_v54 }
 0x2a3   :  { %1554 = vmatprep.subr.bf16.mxu0 %v1024_v55 }
 0x2a6   :  { %1555 = vmatpush1.bf16.msra.mxu0 %v1023_v57 }
 0x2a7   :  { %1556 = vmatprep.subr.bf16.mxu0 %v1031_v58  ;;  %v1086_v58 = vunpack.c.h.s8.bf16 %v694_v30 }
 0x2aa   :  { %1557 = vmatpush1.bf16.msra.mxu0 %v1030_v60 }
 0x2ab   :  { %1569 = vmatprep.subr.bf16.mxu0 %v1038_v61 }
 0x2ad   :  { %1559 = vmatmul.mubr.bf16.vlgmr.msra.gmra.mrb[8].mxu0 %v3313_v23  ;;  %v3367_v23 = vld [vmem:[%s3435_s4] sm:$0xff] }
 0x2ae   :  { %1570 = vmatpush1.bf16.msra.mxu0 %v1037_v63  ;;  %1601 = vmatprep.mubr.bf16.mxu0 %v3137_v0  ;;  %v1073_v0 = vunpack.c.h.s8.bf16 %v688_v4  ;;  %v1781_v16 = vrot.slane %v3367_v23, %v3271_v10  ;;  %v1789_v17 = vrot.slane %v3367_v23, %v3296_v38  ;;  %v1785_v18 = vrot.slane %v3367_v23, %v3279_v12 }
 0x2af   :  { %1571 = vmatprep.subr.bf16.mxu0 %v1045_v1  ;;  %v1793_v19 = vrot.slane %v3367_v23, %v3301_v41  ;;  %v1079_v38 = vunpack.c.l.s8.bf16 %v694_v30  ;;  %v2956_v30 = vld [vmem:[#allocation10 + $0xf0] sm:$0xff]  }
 0x2b2   :  { %1572 = vmatpush1.bf16.msra.mxu0 %v1044_v9 }
 0x2b3   :  { %1573 = vmatprep.subr.bf16.mxu0 %v1052_v2 }
 0x2b6   :  { %1574 = vmatpush1.bf16.msra.mxu0 %v1051_v11 }
 0x2b7   :  { %1575 = vmatprep.subr.bf16.mxu0 %v1059_v3  ;;  %v2945_v3 = vld [vmem:[#allocation10 + $0x80] sm:$0xff]  }
 0x2ba   :  { %1576 = vmatpush1.bf16.msra.mxu0 %v1058_v5  ;;  %v2946_v5 = vld [vmem:[#allocation10 + $0xc8] sm:$0xff]  }
 0x2bb   :  { %1577 = vmatprep.subr.bf16.mxu0 %v1066_v6  ;;  %v2960_v6 = vld [vmem:[#allocation10 + $0x180] sm:$0xff]  }
 0x2be   :  { %1578 = vmatpush1.bf16.msra.mxu0 %v1065_v8  ;;  %v2948_v8 = vld [vmem:[#allocation10 + $0xd0] sm:$0xff]  }
 0x2bf   :  { %1579 = vmatprep.subr.bf16.mxu0 %v1073_v0  ;;  %v2961_v0 = vld [vmem:[#allocation10 + $0x188] sm:$0xff]  }
 0x2c0   :  { %v1259_v25 = vpop.f32.mrb[4].mxu0  ;;  %v1431_v26 = vpop.f32.mrb[12].mxu1 }
 0x2c1   :  { %v1813_v40 = vmul.f32 %v1781_v16, %v1259_v25  ;;  %v1815_v34 = vmul.f32 %v1789_v17, %v1431_v26  ;;  %v1261_v37 = vpop.f32.mrb[5].mxu0  ;;  %v1433_v39 = vpop.f32.mrb[13].mxu1  ;;  %v2965_v25 = vld [vmem:[#allocation10 + $0x1a8] sm:$0xff]  }
 0x2c2   :  { %v1814_v42 = vmul.f32 %v1785_v18, %v1261_v37  ;;  %v1816_v10 = vmul.f32 %v1793_v19, %v1433_v39  ;;  %v1263_v43 = vpop.f32.mrb[6].mxu0  ;;  %v1435_v32 = vpop.f32.mrb[14].mxu1  ;;  %1580 = vmatpush1.bf16.msra.mxu0 %v1072_v20  ;;  %v2953_v20 = vld [vmem:[#allocation10 + $0xa0] sm:$0xff]   ;;  %v2958_v37 = vld [vmem:[#allocation10 + $0xf8] sm:$0xff]   ;;  %v2966_v39 = vld [vmem:[#allocation10 + $0x1b0] sm:$0xff]  }
 0x2c3   :  { %v1864_v45 = vadd.f32 %v1832_v21, %v1813_v40  ;;  %v1866_v46 = vadd.f32 %v1840_v22, %v1815_v34  ;;  %v1820_v47 = vmul.f32 %v1781_v16, %v1263_v43  ;;  %v1822_v48 = vmul.f32 %v1789_v17, %v1435_v32  ;;  %v1265_v49 = vpop.f32.mrb[7].mxu0  ;;  %v1437_v12 = vpop.f32.mrb[15].mxu1  ;;  %1581 = vmatprep.subr.bf16.mxu0 %v1080_v24  ;;  %v2950_v16 = vld [vmem:[#allocation10 + $0xd8] sm:$0xff]   ;;  %v2962_v17 = vld [vmem:[#allocation10 + $0x190] sm:$0xff]   ;;  %v2955_v24 = vld [vmem:[#allocation10 + $0xa8] sm:$0xff]  }
 0x2c4   :  { %v1865_v50 = vadd.f32 %v1836_v27, %v1814_v42  ;;  %v1867_v41 = vadd.f32 %v1844_v28, %v1816_v10  ;;  %v1821_v51 = vmul.f32 %v1785_v18, %v1265_v49  ;;  %v1823_v53 = vmul.f32 %v1793_v19, %v1437_v12  ;;  %v2952_v18 = vld [vmem:[#allocation10 + $0xe0] sm:$0xff]   ;;  %v2963_v19 = vld [vmem:[#allocation10 + $0x198] sm:$0xff]  }
 0x2c5   :  { %v1871_v54 = vadd.f32 %v1832_v21, %v1820_v47  ;;  %v1873_v55 = vadd.f32 %v1840_v22, %v1822_v48  ;;  %v1878_v59 = vmax.f32 %v1864_v45, 0.0  ;;  %v1880_v60 = vmax.f32 %v1866_v46, 0.0  ;;  %v2954_v21 = vld [vmem:[#allocation10 + $0xe8] sm:$0xff]   ;;  %v2964_v22 = vld [vmem:[#allocation10 + $0x1a0] sm:$0xff]   ;;  %v2959_v43 = vld [vmem:[#allocation10 + $0xb8] sm:$0xff]  }
 0x2c6   :  { %v1872_v56 = vadd.f32 %v1836_v27, %v1821_v51  ;;  %v1874_v57 = vadd.f32 %v1844_v28, %v1823_v53  ;;  %1582 = vmatpush1.bf16.msra.mxu0 %v1079_v38  ;;  %v1879_v63 = vmax.f32 %v1865_v50, 0.0  ;;  %v1881_v1 = vmax.f32 %v1867_v41, 0.0  ;;  %v2957_v28 = vld [vmem:[#allocation10 + $0xb0] sm:$0xff]   ;;  %v2967_v32 = vld [vmem:[#allocation10 + $0x1b8] sm:$0xff]   ;;  %v2968_v38 = vld [vmem:[#allocation10 + $0x140] sm:$0xff]  }
 0x2c7   :  { %v1885_v61 = vmax.f32 %v1871_v54, 0.0  ;;  %v1887_v62 = vmax.f32 %v1873_v55, 0.0  ;;  %1583 = vmatprep.subr.bf16.mxu0 %v1087_v44  ;;  %v2969_v44 = vld [vmem:[#allocation10 + $0x100] sm:$0xff]   ;;  %v2970_v45 = vld [vmem:[#allocation10 + $0x148] sm:$0xff]   ;;  %v2972_v47 = vld [vmem:[#allocation10 + $0x150] sm:$0xff]  }
 0x2c8   :  { %v1886_v35 = vmax.f32 %v1872_v56, 0.0  ;;  %v1888_v9 = vmax.f32 %v1874_v57, 0.0  ;;  %v2971_v46 = vld [vmem:[#allocation10 + $0x108] sm:$0xff]   ;;  %v2973_v48 = vld [vmem:[#allocation10 + $0x110] sm:$0xff]   ;;  %v2974_v49 = vld [vmem:[#allocation10 + $0x158] sm:$0xff]  }
 0x2c9   :  { %v1892_v2 = vpack.c.bf16 %v1885_v61, %v1878_v59  ;;  %v3387_v33 = vpack.c.bf16 %v1887_v62, %v1880_v60  ;;  %v2975_v12 = vld [vmem:[#allocation10 + $0x118] sm:$0xff]   ;;  %v2976_v50 = vld [vmem:[#allocation10 + $0x160] sm:$0xff]   ;;  %v2978_v60 = vld [vmem:[#allocation10 + $0x168] sm:$0xff]  }
 0x2ca   :  { %1584 = vmatpush1.bf16.msra.mxu0 %v1086_v58  ;;  %v1893_v11 = vpack.c.bf16 %v1886_v35, %v1879_v63  ;;  %v1895_v4 = vpack.c.bf16 %v1888_v9, %v1881_v1  ;;  %v2979_v62 = vld [vmem:[#allocation10 + $0x128] sm:$0xff]  }
 0x2cb   :  { %2815 = vmatprep.subr.bf16.mxu0 %v3138_v36 }
 0x2cc   :  { %2386 = vmatprep.mubr.bf16.mxu1 %v1893_v11  ;;  %v2981_v11 = vld [vmem:[#allocation10 + $0x130] sm:$0xff]  }
 0x2cd   :  { %1602 = vmatmul.mubr.bf16.vlgmr.msra.gmra.mrb[8].mxu0 %v3328_v13  ;;  %2387 = vmatmul.mubr.bf16.vlgmr.msra.gmra.mrb[32].mxu1 %v1892_v2  ;;  %v2951_v13 = vld [vmem:[#allocation10 + $0x98] sm:$0xff]  }
 0x2ce   :  { %2731 = vmatpush3.bf16.msra.mxu1 %v2945_v3  ;;  %2427 = vmatprep.mubr.bf16.mxu1 %v1895_v4  ;;  %v2982_v4 = vld [vmem:[#allocation10 + $0x178] sm:$0xff]  }
 0x2cf   :  { %2732 = vmatprep.subr.bf16.mxu1 %v2946_v5  ;;  %2816 = vmatpush3.bf16.msra.mxu0 %v2960_v6  ;;  %v2983_v5 = vld [vmem:[#allocation10 + $0x138] sm:$0xff]   ;;  %v1805_v6 = vrot.slane %v3367_v23, %v3324_v52 }
 0x2d0   :  { %2817 = vmatprep.subr.bf16.mxu0 %v3138_v36  ;;  %2831 = vmatprep.mubr.msk.bf16.mxu0 %vm3139_vm1, %v3138_v36 }
 0x2d2   :  { %2733 = vmatpush3.bf16.msra.mxu1 %v2947_v7 }
 0x2d3   :  { %2734 = vmatprep.subr.bf16.mxu1 %v2948_v8  ;;  %2818 = vmatpush3.bf16.msra.mxu0 %v2961_v0  ;;  %v1856_v0 = vrot.slane %v3369_v14, %v3324_v52  ;;  %v1848_v52 = vrot.slane %v3369_v14, %v3286_v29 }
 0x2d4   :  { %2819 = vmatprep.subr.bf16.mxu0 %v3138_v36 }
 0x2d6   :  { %2735 = vmatpush3.bf16.msra.mxu1 %v2949_v15 }
 0x2d7   :  { %2736 = vmatprep.subr.bf16.mxu1 %v2950_v16  ;;  %2820 = vmatpush3.bf16.msra.mxu0 %v2962_v17 }
 0x2d8   :  { %2821 = vmatprep.subr.bf16.mxu0 %v3138_v36 }
 0x2da   :  { %2737 = vmatpush3.bf16.msra.mxu1 %v2951_v13 }
 0x2db   :  { %2738 = vmatprep.subr.bf16.mxu1 %v2952_v18  ;;  %2822 = vmatpush3.bf16.msra.mxu0 %v2963_v19 }
 0x2dc   :  { %2823 = vmatprep.subr.bf16.mxu0 %v3138_v36 }
 0x2de   :  { %2739 = vmatpush3.bf16.msra.mxu1 %v2953_v20 }
 0x2df   :  { %2740 = vmatprep.subr.bf16.mxu1 %v2954_v21  ;;  %2824 = vmatpush3.bf16.msra.mxu0 %v2964_v22 }
 0x2e0   :  { %2825 = vmatprep.subr.bf16.mxu0 %v3138_v36 }
 0x2e1   :  { %v2649_v26 = vpop.f32.mrb[16].mxu1 }
 0x2e2   :  { %v2650_v27 = vpop.f32.mrb[17].mxu1  ;;  %2741 = vmatpush3.bf16.msra.mxu1 %v2955_v24 }
 0x2e3   :  { %v2651_v40 = vadd.f32 %v2650_v27, %v2649_v26  ;;  %v2652_v34 = vpop.f32.mrb[18].mxu1  ;;  %2742 = vmatprep.subr.bf16.mxu1 %v2956_v30  ;;  %2826 = vmatpush3.bf16.msra.mxu0 %v2965_v25  ;;  %v1797_v25 = vrot.slane %v3367_v23, %v3286_v29  ;;  %v1801_v26 = vrot.slane %v3367_v23, %v3291_v31 }
 0x2e4   :  { %v2653_v42 = vpop.f32.mrb[19].mxu1  ;;  %2827 = vmatprep.subr.bf16.mxu0 %v3138_v36 }
 0x2e5   :  { %v2654_v10 = vadd.f32 %v2653_v42, %v2652_v34 }
 0x2e6   :  { %2743 = vmatpush3.bf16.msra.mxu1 %v2957_v28 }
 0x2e7   :  { %2744 = vmatprep.subr.bf16.mxu1 %v2958_v37  ;;  %2828 = vmatpush3.bf16.msra.mxu0 %v2966_v39 }
 0x2e8   :  { %2829 = vmatprep.subr.bf16.mxu0 %v3138_v36  ;;  %v2977_v36 = vld [vmem:[#allocation10 + $0x120] sm:$0xff]  }
 0x2ea   :  { %2745 = vmatpush3.bf16.msra.mxu1 %v2959_v43 }
 0x2eb   :  { %2830 = vmatpush3.bf16.msra.mxu0 %v2967_v32  ;;  %2752 = vmatprep.subr.bf16.mxu1 %v2968_v38 }
 0x2ed   :  { %2428 = vmatmul.mubr.bf16.vlgmr.msra.gmra.mrb[36].mxu1 %v3387_v33  ;;  %v2980_v33 = vld [vmem:[#allocation10 + $0x170] sm:$0xff]  }
 0x2ee   :  { %2753 = vmatpush3.bf16.msra.mxu1 %v2969_v44 }
 0x2ef   :  { %2754 = vmatprep.subr.bf16.mxu1 %v2970_v45 }
 0x2f2   :  { %2755 = vmatpush3.bf16.msra.mxu1 %v2971_v46 }
 0x2f3   :  { %2756 = vmatprep.subr.bf16.mxu1 %v2972_v47 }
 0x2f6   :  { %2757 = vmatpush3.bf16.msra.mxu1 %v2973_v48 }
 0x2f7   :  { %2758 = vmatprep.subr.bf16.mxu1 %v2974_v49 }
 0x2fa   :  { %2759 = vmatpush3.bf16.msra.mxu1 %v2975_v12 }
 0x2fb   :  { %2760 = vmatprep.subr.bf16.mxu1 %v2976_v50 }
 0x2fe   :  { %2761 = vmatpush3.bf16.msra.mxu1 %v2977_v36 }
 0x2ff   :  { %2762 = vmatprep.subr.bf16.mxu1 %v2978_v60 }
 0x301   :  { %v2671_v41 = vpop.f32.mrb[20].mxu1 }
 0x302   :  { %v2672_v51 = vpop.f32.mrb[21].mxu1  ;;  %2763 = vmatpush3.bf16.msra.mxu1 %v2979_v62 }
 0x303   :  { %v2673_v53 = vadd.f32 %v2672_v51, %v2671_v41  ;;  %v2674_v54 = vpop.f32.mrb[22].mxu1  ;;  %2764 = vmatprep.subr.bf16.mxu1 %v2980_v33  ;;  %v2571_v51 = vld [vmem:[%s3438_s7] ss:$0 sm:$0xff]  ;;  %s3140_s7 = smov [#allocation11]  }
 0x304   :  { %v2675_v55 = vpop.f32.mrb[23].mxu1  ;;  %s2525_s1 = sshll.u32 %s3140_s7, 4  ;;  %s2526_s1 = int_to_ptr.vmem [resolvable:$true] %s2525_s1 }
 0x305   :  { %v1688_v56 = vadd.f32 %v2673_v53, %v2651_v40  ;;  %v2676_v57 = vadd.f32 %v2675_v55, %v2674_v54  ;;  %v1852_v40 = vrot.slane %v3369_v14, %v3291_v31  ;;  %s3094_s28 = scalar_lea.vmem %s2526_s1, 256  ;;  %p3099_p13 = scmp.lt.s32.totalorder %s2526_s1, %s2526_s1 }
 0x306   :  { %2765 = vmatpush3.bf16.msra.mxu1 %v2981_v11  ;;  %p3095_p12 = scmp.ne.s32.totalorder %s2526_s1, %s3094_s28  ;;  %p3100_p0 = scmp.lt.s32.totalorder %s3094_s28, %s3094_s28 }
 0x307   :  { %v1691_v58 = vadd.f32 %v2676_v57, %v2654_v10  ;;  %2766 = vmatprep.subr.bf16.mxu1 %v2982_v4 }
 0x308   :  { %p3101_p1 = por %p3100_p0, %p3099_p13 }
 0x30a   :  { %2767 = vmatpush3.bf16.msra.mxu1 %v2983_v5  ;;  %p3102_p2 = pnand %p3101_p1, %p3095_p12 }
 0x321   :  { %v2693_v59 = vpop.f32.mrb[24].mxu1 }
 0x322   :  { %v2694_v61 = vpop.f32.mrb[25].mxu1 }
 0x323   :  { %v2695_v63 = vadd.f32 %v2694_v61, %v2693_v59  ;;  %v2696_v1 = vpop.f32.mrb[26].mxu1 }
 0x324   :  { %v2697_v35 = vpop.f32.mrb[27].mxu1 }
 0x325   :  { %v2698_v9 = vadd.f32 %v2697_v35, %v2696_v1  ;;  %v1729_v2 = vadd.f32 %v2695_v63, %v1688_v56 }
 0x327   :  { %v1732_v3 = vadd.f32 %v2698_v9, %v1691_v58 }
 0x341   :  { %v1769_v7 = vpop.f32.mrb[28].mxu1 }
 0x342   :  { %v1770_v8 = vadd.f32 %v1769_v7, %v1729_v2  ;;  %v2813_v15 = vpop.f32.mrb[29].mxu1 }
 0x343   :  { %v1772_v16 = vpop.f32.mrb[30].mxu1 }
 0x344   :  { %v1819_v17 = vmul.f32 %v1805_v6, %v1770_v8  ;;  %v1773_v13 = vadd.f32 %v1772_v16, %v1732_v3  ;;  %v2814_v18 = vpop.f32.mrb[31].mxu1 }
 0x346   :  { %v1870_v19 = vadd.f32 %v1856_v0, %v1819_v17  ;;  %v1826_v20 = vmul.f32 %v1805_v6, %v1773_v13 }
 0x348   :  { %v1877_v21 = vadd.f32 %v1856_v0, %v1826_v20  ;;  %v1884_v22 = vmax.f32 %v1870_v19, 0.0 }
 0x34a   :  { %v1891_v24 = vmax.f32 %v1877_v21, 0.0 }
 0x34c   :  { %v1898_v30 = vpack.c.bf16 %v1891_v24, %v1884_v22 }
 0x34e   :  { %2832 = vmatmul.mubr.bf16.vlgmr.msra.gmra.mrb[12].mxu0 %v1898_v30 }
 0x3a0   :  { %v1603_v27 = vpop.f32.mrb[8].mxu0  ;;  %v2724_v28 = vpop.f32.mrb[32].mxu1 }
 0x3a1   :  { %v1817_v34 = vmul.f32 %v1797_v25, %v1603_v27  ;;  %v1605_v37 = vpop.f32.mrb[9].mxu0  ;;  %v2725_v39 = vpop.f32.mrb[33].mxu1 }
 0x3a2   :  { %v1818_v42 = vmul.f32 %v1801_v26, %v1605_v37  ;;  %v2726_v10 = vadd.f32 %v2725_v39, %v2724_v28  ;;  %v1607_v43 = vpop.f32.mrb[10].mxu0  ;;  %v2727_v32 = vpop.f32.mrb[34].mxu1 }
 0x3a3   :  { %v1868_v38 = vadd.f32 %v1848_v52, %v1817_v34  ;;  %v1824_v44 = vmul.f32 %v1797_v25, %v1607_v43  ;;  %v1609_v45 = vpop.f32.mrb[11].mxu0  ;;  %v2728_v46 = vpop.f32.mrb[35].mxu1 }
 0x3a4   :  { %v1869_v23 = vadd.f32 %v1852_v40, %v1818_v42  ;;  %v1825_v47 = vmul.f32 %v1801_v26, %v1609_v45  ;;  %v2729_v48 = vadd.f32 %v2728_v46, %v2727_v32  ;;  %v2389_v55 = vadd.f32 %v2726_v10, %v2571_v51 }
 0x3a5   :  { %v1875_v29 = vadd.f32 %v1848_v52, %v1824_v44  ;;  %v1882_v12 = vmax.f32 %v1868_v38, 0.0 }
 0x3a6   :  { %v1876_v49 = vadd.f32 %v1852_v40, %v1825_v47  ;;  %v1883_v36 = vmax.f32 %v1869_v23, 0.0  ;;  %v2392_v59 = vadd.f32 %v2729_v48, %v2571_v51 }
 0x3a7   :  { %v1889_v50 = vmax.f32 %v1875_v29, 0.0 }
 0x3a8   :  { %v1890_v31 = vmax.f32 %v1876_v49, 0.0 }
 0x3a9   :  { %v1896_v14 = vpack.c.bf16 %v1889_v50, %v1882_v12 }
 0x3aa   :  { %v1897_v41 = vpack.c.bf16 %v1890_v31, %v1883_v36 }
 0x3ac   :  { %2468 = vmatprep.mubr.bf16.mxu1 %v1897_v41 }
 0x3ad   :  { %2469 = vmatmul.mubr.bf16.vlgmr.msra.gmra.mrb[40].mxu1 %v1896_v14 }
 0x3c0   :  { %v2746_v53 = vpop.f32.mrb[36].mxu1 }
 0x3c1   :  { %v2747_v54 = vpop.f32.mrb[37].mxu1 }
 0x3c2   :  { %v2748_v56 = vadd.f32 %v2747_v54, %v2746_v53  ;;  %v2749_v57 = vpop.f32.mrb[38].mxu1 }
 0x3c3   :  { %v2750_v58 = vpop.f32.mrb[39].mxu1 }
 0x3c4   :  { %v2430_v60 = vadd.f32 %v2748_v56, %v2389_v55  ;;  %v2751_v61 = vadd.f32 %v2750_v58, %v2749_v57 }
 0x3c6   :  { %v2433_v62 = vadd.f32 %v2751_v61, %v2392_v59 }
 0x421   :  { %v2511_v63 = vpop.f32.mrb[12].mxu0 }
 0x422   :  { %v2833_v1 = vpop.f32.mrb[13].mxu0 }
 0x423   :  { %v2514_v35 = vpop.f32.mrb[14].mxu0 }
 0x424   :  { %v2834_v9 = vpop.f32.mrb[15].mxu0 }
 0x480   :  { %v2768_v2 = vpop.f32.mrb[40].mxu1 }
 0x481   :  { %v2769_v33 = vpop.f32.mrb[41].mxu1 }
 0x482   :  { %v2770_v11 = vadd.f32 %v2769_v33, %v2768_v2  ;;  %v2771_v3 = vpop.f32.mrb[42].mxu1 }
 0x483   :  { %v2772_v4 = vpop.f32.mrb[43].mxu1 }
 0x484   :  { %v2471_v5 = vadd.f32 %v2770_v11, %v2430_v60  ;;  %v2773_v6 = vadd.f32 %v2772_v4, %v2771_v3 }
 0x486   :  { %v2512_v7 = vadd.f32 %v2511_v63, %v2471_v5  ;;  %v2474_v8 = vadd.f32 %v2773_v6, %v2433_v62 }
 0x488   :  { %2518 = vst [vmem:[#allocation11] sm:$0xff] %v2512_v7  ;;  %v2515_v0 = vadd.f32 %v2514_v35, %v2474_v8 }
 0x48a   :  { %2519 = vst [vmem:[#allocation11 + $0x8] sm:$0xff] %v2515_v0 }
 0x48b   :  { %3105 = shalt.err (!%p3102_p2)
}
 0x48c   :  { %s3106_s22 = scalar_lea.hbm %s3439_s8, 256 }
 0x48d   :  { %p3107_p3 = scmp.ne.s32.totalorder %s3439_s8, %s3106_s22  ;;  %p3110_p4 = scmp.lt.u32.totalorder %s3106_s22, %s3439_s8 }
 0x48f   :  { %p3112_p5 = pnand %p3110_p4, %p3107_p3 }
 0x491   :  { %3115 = shalt.err (!%p3112_p5)
}
 0x492   :  { %2531 = dma.vmem_to_hbm [thread:$0]  %s2526_s1, 256, %s3439_s8, [#allocation4], %s3129_s5, %s3129_s5, %s3130_s19  }
 0x493   :  { %3122 = dma.done.wait [#allocation4], 256  }
 0x494   :  { %3123 = vsyncadd [#allocation4], 4294967040 }
 0x495   :  { %2535 = vsyncpa [#allocation3], 1 }
 0x496   :  { %2536 = vsyncpa [#allocation6], 1 }
 0x497   :  { %2537 = vsyncpa [#allocation9], 1 }
 0x498   :  { %2538 = vsyncpa [#allocation4], 1 }

</bundles_post_ra>
